<compile_context>
chip_gen: v7x
topology: tpu7x:2x2x1
jax: 0.10.0
libtpu: 0.0.40
codegen_flags: <defaults>
</compile_context>

<pallas_src>
import functools
import math

import jax
import jax.numpy as jnp
from jax.experimental import pallas as pl
from jax.experimental.pallas import tpu as pltpu


def _round_up(x, m):
    return (x + m - 1) // m * m


def _pick_tile_n(npad, target):
    """Largest multiple of 128 that divides `npad` and is <= target."""
    best = 128
    t = 128
    cap = min(target, npad)
    while t <= cap:
        if npad % t == 0:
            best = t
        t += 128
    return best


def precompute_projection(lap, kernel_size):
    """T_k(L), k = 0..K-1, stacked to (K, V, V). Port of the PyTorch helper."""
    v = lap.shape[0]
    hp = jax.lax.Precision.HIGHEST
    polys = [jnp.eye(v, dtype=lap.dtype)]
    if kernel_size > 1:
        polys.append(lap)
        for _ in range(2, kernel_size):
            polys.append(2.0 * jnp.matmul(lap, polys[-1], precision=hp) - polys[-2])
    return jnp.stack(polys[:kernel_size], axis=0)


def _fuse_weight_into_projector(lap, weight, kernel_size, fin, fout, compute_dtype):
    """M[(fo, v'), (fin, v)] = sum_k W[k*Fin + fin, fo] * T_k(L)[v, v'].

    The k-sum is done in f32; only the final fused matrix is cast to
    `compute_dtype` (per the review's correctness note)."""
    proj = precompute_projection(lap.astype(jnp.float32), kernel_size)  # T_k[v, v']
    proj_t = jnp.transpose(proj, (0, 2, 1))                             # P[k, v', v] = T_k[v, v']
    w_r = weight.astype(jnp.float32).reshape(kernel_size, fin, fout)    # W[k, fin, fo]
    v = lap.shape[0]
    m = jnp.einsum('kfo,kuv->oufv', w_r, proj_t,
                   precision=jax.lax.Precision.HIGHEST)                 # (Fout, V', Fin, V)
    return m.reshape(fout * v, fin * v).astype(compute_dtype)


def _make_kernel(fin, v, fout, tile_n, compute_dtype):
    """Kernel body for one (batch b, lane tile i) grid point."""

    def kernel(x_ref, m_ref, b_ref, o_ref):
        # x_ref: (Fin, V, TN)        x.dtype (f32)  VMEM, lanes = TN (lane-dense)
        # m_ref: (Fout*V, Fin*V)     compute_dtype  VMEM (grid-invariant, tiny)
        # b_ref: (Fout*V, 1)         f32            VMEM (bias per (fo, v') row)
        # o_ref: (Fout, V, TN)       out dtype      VMEM (lane-dense -> unmasked vst)
        xb = x_ref[...].reshape(fin * v, tile_n).astype(compute_dtype)
        y = jnp.dot(m_ref[...], xb, preferred_element_type=jnp.float32)  # (Fout*V, TN)
        y = y + b_ref[...]                                               # lane broadcast
        o_ref[...] = y.reshape(fout, v, tile_n).astype(o_ref.dtype)

    return kernel


def cheb_conv_forward(x, lap, weight, bias, kernel_size, *,
                      tile_n=2048, compute_dtype=jnp.bfloat16, out_dtype=None):
    """ChebConv.forward: x (B, Fin, V, X, Y, Z) -> (B, Fout, V, X, Y, Z)."""
    B, Fin, V, X, Y, Z = x.shape
    K = kernel_size
    KFin, Fout = weight.shape
    assert KFin == K * Fin, (KFin, K, Fin)
    out_dtype = x.dtype if out_dtype is None else out_dtype

    N = X * Y * Z
    Npad = _round_up(N, 128)
    tile_n = _pick_tile_n(Npad, tile_n)
    num_tiles = Npad // tile_n

    # Native layout: (B, Fin, V, X*Y*Z).  This reshape of contiguous trailing
    # dims is free (no transpose / relayout HBM pass).
    x4 = x.reshape(B, Fin, V, N)
    if Npad != N:
        # TODO(synk): only taken when X*Y*Z is not a multiple of 128; costs one
        # pad copy and one output slice.
        x4 = jnp.pad(x4, ((0, 0), (0, 0), (0, 0), (0, Npad - N)))

    m_mat = _fuse_weight_into_projector(lap, weight, K, Fin, Fout, compute_dtype)

    if bias is None:
        b_vec = jnp.zeros((Fout * V, 1), jnp.float32)
    else:
        b_flat = jnp.reshape(bias.astype(jnp.float32), (Fout,))
        b_vec = jnp.broadcast_to(b_flat[:, None, None], (Fout, V, 1)).reshape(Fout * V, 1)

    kernel = _make_kernel(Fin, V, Fout, tile_n, compute_dtype)

    x_bytes = x4.size * x4.dtype.itemsize
    out_bytes = B * Fout * V * Npad * jnp.dtype(out_dtype).itemsize
    m_bytes = m_mat.size * m_mat.dtype.itemsize
    flops = 2 * B * Npad * (Fout * V) * (Fin * V)

    blk_in = Fin * V * tile_n * x4.dtype.itemsize
    blk_out = Fout * V * tile_n * jnp.dtype(out_dtype).itemsize
    vmem_bytes = 4 * (blk_in + blk_out) + m_bytes + b_vec.size * 4 + (4 << 20)
    vmem_bytes = int(max(8 << 20, min(vmem_bytes, 32 << 20)))

    out = pl.pallas_call(
        kernel,
        out_shape=jax.ShapeDtypeStruct((B, Fout, V, Npad), out_dtype),
        grid_spec=pltpu.PrefetchScalarGridSpec(
            num_scalar_prefetch=0,
            grid=(B, num_tiles),
            in_specs=[
                pl.BlockSpec((None, Fin, V, tile_n), lambda b, i: (b, 0, 0, i)),
                pl.BlockSpec((Fout * V, Fin * V), lambda b, i: (0, 0)),
                pl.BlockSpec((Fout * V, 1), lambda b, i: (0, 0)),
            ],
            out_specs=pl.BlockSpec((None, Fout, V, tile_n),
                                   lambda b, i: (b, 0, 0, i)),
        ),
        compiler_params=pltpu.CompilerParams(
            dimension_semantics=("parallel", "parallel"),
            vmem_limit_bytes=vmem_bytes,
        ),
        cost_estimate=pl.CostEstimate(flops=flops, transcendentals=0,
                                      bytes_accessed=x_bytes + out_bytes + m_bytes),
    )(x4, m_mat, b_vec)                                               # (B, Fout, V, Npad)

    if Npad != N:
        out = out[..., :N]
    return out.reshape(B, Fout, V, X, Y, Z)


def init_cheb_conv_params(key, in_channels, out_channels, kernel_size, bias=True):
    """Kaiming init matching ChebConv.kaiming_initialization."""
    std = math.sqrt(2.0 / (in_channels * kernel_size))
    w = std * jax.random.normal(
        key, (kernel_size * in_channels, out_channels), jnp.float32)
    b = jnp.full((out_channels,), 0.01, jnp.float32) if bias else None
    return w, b


def ring_laplacian(num_vertices):
    """Rescaled symmetric-normalized ring-graph Laplacian (eigenvalues in [-1, 1])."""
    idx = jnp.arange(num_vertices)
    adj = jnp.zeros((num_vertices, num_vertices), jnp.float32)
    adj = adj.at[idx, (idx + 1) % num_vertices].set(1.0)
    adj = adj.at[idx, (idx - 1) % num_vertices].set(1.0)
    dinv = 1.0 / jnp.sqrt(adj.sum(axis=1))
    lap = jnp.eye(num_vertices, dtype=jnp.float32) - dinv[:, None] * adj * dinv[None, :]
    return lap - jnp.eye(num_vertices, dtype=jnp.float32)


if __name__ == "__main__":
    # Small shapes consistent with the module's 6-D input (B, Fin, V, X, Y, Z).
    B, Fin, Fout, V, K = 2, 4, 8, 8, 3
    X = Y = Z = 16

    key = jax.random.PRNGKey(0)
    kx, kw = jax.random.split(key)
    x = jax.random.normal(kx, (B, Fin, V, X, Y, Z), jnp.float32)
    lap = ring_laplacian(V)
    weight, bias = init_cheb_conv_params(kw, Fin, Fout, K, bias=True)

    fwd = jax.jit(functools.partial(cheb_conv_forward, kernel_size=K))
    out = jax.block_until_ready(fwd(x, lap, weight, bias))
    assert out.shape == (B, Fout, V, X, Y, Z), out.shape

    hp = jax.lax.Precision.HIGHEST

    # Reference 1 (tight): the module math algebraically refactored into the same
    # fused W-into-projector form, fed the same bf16-rounded operands the kernel
    # uses — validates the kernel mechanics exactly.
    m_bf = _fuse_weight_into_projector(lap, weight, K, Fin, Fout, jnp.bfloat16)
    m_f32 = m_bf.astype(jnp.float32)
    x_bf = x.astype(jnp.bfloat16).astype(jnp.float32).reshape(B, Fin * V, X * Y * Z)
    ref1 = jnp.einsum('ou,bun->bon', m_f32, x_bf, precision=hp)
    ref1 = ref1.reshape(B, Fout, V, X, Y, Z) + bias[None, :, None, None, None, None]
    err1 = float(jnp.max(jnp.abs(out - ref1)))
    assert jnp.allclose(out, ref1, atol=1e-3, rtol=1e-3), err1

    # Reference 2 (loose): the PyTorch module's exact op sequence in full f32,
    # no bf16 rounding anywhere — bounds the bf16 compute error end-to-end.
    proj = precompute_projection(lap, K)                              # (K, V, V)
    projector = jnp.transpose(proj, (0, 2, 1)).reshape(K * V, V)
    t = jnp.transpose(x, (2, 1, 0, 3, 4, 5)).reshape(V, Fin * B * X * Y * Z)
    t = jnp.matmul(projector, t, precision=hp)                        # (K*V, Fin*B*XYZ)
    t = t.reshape(K, V, Fin, B, X, Y, Z)
    t = jnp.transpose(t, (3, 1, 4, 5, 6, 0, 2)).reshape(B * V * X * Y * Z, K * Fin)
    t = jnp.matmul(t, weight, precision=hp) + bias[None, :]
    ref2 = jnp.transpose(t.reshape(B, V, X, Y, Z, Fout), (0, 5, 1, 2, 3, 4))
    err2 = float(jnp.max(jnp.abs(out - ref2)))
    assert jnp.allclose(out, ref2, atol=6e-2, rtol=6e-2), err2

    print("KERNEL_OK")
</pallas_src>

<mosaic_0001>
module attributes {stable_mosaic.version = 11 : i64} {
  func.func @kernel(%arg0: i32, %arg1: i32, %arg2: memref<1x4x8x2048xf32, #tpu.memory_space<vmem>>, %arg3: memref<64x32xbf16, #tpu.memory_space<vmem>>, %arg4: memref<64x1xf32, #tpu.memory_space<vmem>>, %arg5: memref<1x8x8x2048xf32, #tpu.memory_space<vmem>>) attributes {dimension_semantics = [#tpu.dimension_semantics<parallel>, #tpu.dimension_semantics<parallel>], iteration_bounds = array<i64: 2, 2>, scalar_prefetch = 0 : i64, scratch_operands = 0 : i64, tpu.core_type = #tpu.core_type<tc>, window_params = [{transform_indices = @transform_0, window_bounds = array<i64: 1, 4, 8, 2048>}, {pipeline_mode = #tpu.pipeline_mode<synchronous>, transform_indices = @transform_1, window_bounds = array<i64: 64, 32>}, {pipeline_mode = #tpu.pipeline_mode<synchronous>, transform_indices = @transform_2, window_bounds = array<i64: 64, 1>}, {transform_indices = @transform_3, window_bounds = array<i64: 1, 8, 8, 2048>}]} {
    %c0 = arith.constant 0 : index
    %c0_0 = arith.constant 0 : index
    %c0_1 = arith.constant 0 : index
    %c0_2 = arith.constant 0 : index
    %0 = vector.load %arg2[%c0, %c0_0, %c0_1, %c0_2] : memref<1x4x8x2048xf32, #tpu.memory_space<vmem>>, vector<1x4x8x2048xf32>
    %1 = vector.shape_cast %0 : vector<1x4x8x2048xf32> to vector<4x8x2048xf32>
    %2 = vector.shape_cast %1 : vector<4x8x2048xf32> to vector<32x2048xf32>
    %3 = arith.truncf %2 : vector<32x2048xf32> to vector<32x2048xbf16>
    %c0_3 = arith.constant 0 : index
    %c0_4 = arith.constant 0 : index
    %4 = vector.load %arg3[%c0_3, %c0_4] : memref<64x32xbf16, #tpu.memory_space<vmem>>, vector<64x32xbf16>
    %cst = arith.constant dense<0.000000e+00> : vector<64x2048xf32>
    %5 = tpu.matmul %4, %3, %cst {dimension_numbers = #tpu.dot_dimension_numbers<[1], [0], [0], [1], [0, 0, 1, 1], [], []>} : vector<64x32xbf16>, vector<32x2048xbf16>, vector<64x2048xf32> -> vector<64x2048xf32>
    %c0_5 = arith.constant 0 : index
    %c0_6 = arith.constant 0 : index
    %6 = vector.load %arg4[%c0_5, %c0_6] : memref<64x1xf32, #tpu.memory_space<vmem>>, vector<64x1xf32>
    %7 = vector.broadcast %6 : vector<64x1xf32> to vector<64x2048xf32>
    %8 = arith.addf %5, %7 : vector<64x2048xf32>
    %9 = vector.shape_cast %8 : vector<64x2048xf32> to vector<8x8x2048xf32>
    %c0_7 = arith.constant 0 : index
    %c0_8 = arith.constant 0 : index
    %c0_9 = arith.constant 0 : index
    %c0_10 = arith.constant 0 : index
    %10 = vector.load %arg5[%c0_7, %c0_8, %c0_9, %c0_10] : memref<1x8x8x2048xf32, #tpu.memory_space<vmem>>, vector<1x8x8x2048xf32>
    %11 = vector.shape_cast %10 : vector<1x8x8x2048xf32> to vector<8x8x2048xf32>
    %12 = vector.shape_cast %9 : vector<8x8x2048xf32> to vector<1x8x8x2048xf32>
    tpu.vector_store %arg5[%c0_7, %c0_8, %c0_9, %c0_10], %12 {strides = array<i32>} : memref<1x8x8x2048xf32, #tpu.memory_space<vmem>>, vector<1x8x8x2048xf32>,
    return
  }
  func.func @transform_0(%arg0: i32, %arg1: i32) -> (i32, i32, i32, i32) {
    %c0_i32 = arith.constant 0 : i32
    %c0_i32_0 = arith.constant 0 : i32
    %c0_i32_1 = arith.constant 0 : i32
    return %arg0, %c0_i32, %c0_i32_0, %arg1 : i32, i32, i32, i32
  }
  func.func @transform_1(%arg0: i32, %arg1: i32) -> (i32, i32) {
    %c0_i32 = arith.constant 0 : i32
    %c0_i32_0 = arith.constant 0 : i32
    %c0_i32_1 = arith.constant 0 : i32
    return %c0_i32, %c0_i32_0 : i32, i32
  }
  func.func @transform_2(%arg0: i32, %arg1: i32) -> (i32, i32) {
    %c0_i32 = arith.constant 0 : i32
    %c0_i32_0 = arith.constant 0 : i32
    %c0_i32_1 = arith.constant 0 : i32
    return %c0_i32, %c0_i32_0 : i32, i32
  }
  func.func @transform_3(%arg0: i32, %arg1: i32) -> (i32, i32, i32, i32) {
    %c0_i32 = arith.constant 0 : i32
    %c0_i32_0 = arith.constant 0 : i32
    %c0_i32_1 = arith.constant 0 : i32
    return %arg0, %c0_i32, %c0_i32_0, %arg1 : i32, i32, i32, i32
  }
}

</mosaic_0001>

<bundles_post_ra>
// kernel: cheb_conv_forward.1
= control target key start
LH: loop header
LB: loop body
LE: loop exit
PB: predicated region body
PF: predicated region fallthrough
CT: control target
= control target key end

     0   :  { %s1779_s12 = smov 0   ;;  %s1781_s13 = smov 0   ;;  %s2751_s0 = inlined_call_operand.vmem [shape: f32[2,4,8,4096], index: 0, kind: input, shape index: {}]   ;;  %s2752_s1 = inlined_call_operand.vmem [shape: bf16[64,32], index: 1, kind: input, shape index: {}]   ;;  %s2753_s2 = inlined_call_operand.vmem [shape: f32[64,1], index: 2, kind: input, shape index: {}]   ;;  %s2754_s3 = inlined_call_operand.vmem [shape: f32[2,8,8,4096], index: 3, kind: output, shape index: {}]  }
   0x1   :  { %s1783_s14 = smov 0   ;;  %s1785_s15 = smov 0  }
   0x2   :  { %s1787_s16 = smov 0   ;;  %s1789_s17 = smov 0  }
   0x3   :  { %s1791_s18 = smov 0  }
   0x4 LB: > { %s22_s19 = sadd.s32 1, %s1748_s16  ;;  %s25_s20 = sadd.s32 1, %s1752_s17  ;;  %s1756_s18 = sphi %s1791_s18, %s13_s18   ;;  %s1752_s17 = sphi %s1789_s17, %s2761_s17   ;;  %s1748_s16 = sphi %s1787_s16, %s2760_s16   ;;  %s1744_s15 = sphi %s1785_s15, %s2759_s15   ;;  %s1740_s14 = sphi %s1783_s14, %s2758_s14   ;;  %s1736_s13 = sphi %s1781_s13, %s2757_s13   ;;  %s1732_s12 = sphi %s1779_s12, %s2756_s12  }
   0x5   : > { %p23_p0 = scmp.ge.s32.totalorder %s22_s19, 2  ;;  %s1586_s21 = sadd.s32 4294967295, %s1756_s18  }
   0x6   : > { %p41_p1 = scmp.ne.s32.totalorder %s1736_s13, %s1732_s12  ;;  %p42_p2 = scmp.eq.s32.totalorder %s1756_s18, 0 }
   0x7   : > { %s2763_s19 = smov (%p23_p0, %s22_s19), 0  ;;  %s2765_s20 = smov (!%p23_p0, %s25_s20), %s1752_s17 }
   0x8   : > { %p27_p3 = scmp.ge.s32.totalorder %s2765_s20, 2  ;;  %p115_p4 = scmp.eq.s32.totalorder %s1586_s21, 3 }
   0x9   : > { %s30_s22 = ssub.s32 %s1748_s16, %s2763_s19  ;;  %p43_p5 = por %p42_p2, %p41_p1 }
   0xa   : > { %s2767_s20 = smov (%p27_p3, %s2765_s20), 0  ;;  %p1827_p6 = por %p115_p4, %p41_p1 }
   0xb   : > { %s29_s24 = ssub.s32 %s1752_s17, %s2767_s20  ;;  %s34_s26 = sadd.s32 1, %s1736_s13 }
   0xc   : > { %s31_s25 = sor.u32 %s30_s22, %s29_s24  ;;  %p1589_p8 = scmp.ge.s32.totalorder %s1756_s18, 4 }
   0xd   : > { %p32_p7 = scmp.eq.s32.totalorder %s31_s25, 0 }
   0xe   : > { %143 = sbr.rel (%p1589_p8) target bundleno = 60 (0x3c), region = 24 }
   0xf   : > { %s1835_s27 = scalar_select %p32_p7, %s1736_s13, %s34_s26  }
  0x15   : > { %146 = sbr.rel (!%p43_p5) target bundleno = 60 (0x3c), region = 28  ;;  %s148_s28 = sand.u32 (%p43_p5), 1, %s1736_s13  }
  0x16   : > { %s1591_s29 = sshll.u32 (%p43_p5), %s1748_s16, 4  ;;  %s1590_s30 = sshll.u32 (%p43_p5), %s148_s28, 9 }
  0x17   : > { %s1592_s4 = sshll.u32 (%p43_p5), %s1752_s17, 7  ;;  %s1849_s10 = scalar_lea.vmem (%p43_p5), [#allocation2], %s1590_s30 }
  0x18   : > { %s153_s5 = sadd.s32 (%p43_p5), %s1592_s4, %s1591_s29 }
  0x19   : > { %s1593_s6 = sshll.u32 (%p43_p5), %s153_s5, 3 }
  0x1a   : > { %s1844_s9 = scalar_lea.vmem (%p43_p5), %s2751_s0, %s1593_s6 }
  0x1b   : > { %v168_v0 = vld [vmem:[%s1844_s9] sm:$0xff] (%p43_p5)  ;;  %v170_v1 = vld [vmem:[%s1844_s9 + $0x8] sm:$0xff] (%p43_p5)  ;;  %v172_v2 = vld [vmem:[%s1844_s9 + $0x10] sm:$0xff] (%p43_p5) }
  0x1c   : > { %169 = vst [vmem:[%s1849_s10] sm:$0xff] %v168_v0  ;;  %171 = vst [vmem:[%s1849_s10 + $0x8] sm:$0xff] %v170_v1  ;;  %v174_v3 = vld [vmem:[%s1844_s9 + $0x18] sm:$0xff]  ;;  %v176_v4 = vld [vmem:[%s1844_s9 + $0x20] sm:$0xff] }
  0x1d   : > { %173 = vst [vmem:[%s1849_s10 + $0x10] sm:$0xff] %v172_v2  ;;  %v178_v5 = vld [vmem:[%s1844_s9 + $0x28] sm:$0xff]  ;;  %175 = vst [vmem:[%s1849_s10 + $0x18] sm:$0xff] %v174_v3  ;;  %v180_v6 = vld [vmem:[%s1844_s9 + $0x30] sm:$0xff] }
  0x1e   : > { %177 = vst [vmem:[%s1849_s10 + $0x20] sm:$0xff] %v176_v4  ;;  %179 = vst [vmem:[%s1849_s10 + $0x28] sm:$0xff] %v178_v5  ;;  %v182_v7 = vld [vmem:[%s1844_s9 + $0x38] sm:$0xff]  ;;  %v184_v8 = vld [vmem:[%s1844_s9 + $0x40] sm:$0xff] }
  0x1f   : > { %181 = vst [vmem:[%s1849_s10 + $0x30] sm:$0xff] %v180_v6  ;;  %183 = vst [vmem:[%s1849_s10 + $0x38] sm:$0xff] %v182_v7  ;;  %v186_v9 = vld [vmem:[%s1844_s9 + $0x48] sm:$0xff]  ;;  %v188_v10 = vld [vmem:[%s1844_s9 + $0x50] sm:$0xff] }
  0x20   : > { %185 = vst [vmem:[%s1849_s10 + $0x40] sm:$0xff] %v184_v8  ;;  %v190_v11 = vld [vmem:[%s1844_s9 + $0x58] sm:$0xff]  ;;  %187 = vst [vmem:[%s1849_s10 + $0x48] sm:$0xff] %v186_v9  ;;  %v192_v12 = vld [vmem:[%s1844_s9 + $0x60] sm:$0xff] }
  0x21   : > { %189 = vst [vmem:[%s1849_s10 + $0x50] sm:$0xff] %v188_v10  ;;  %191 = vst [vmem:[%s1849_s10 + $0x58] sm:$0xff] %v190_v11  ;;  %v194_v13 = vld [vmem:[%s1844_s9 + $0x68] sm:$0xff]  ;;  %v196_v14 = vld [vmem:[%s1844_s9 + $0x70] sm:$0xff] }
  0x22   : > { %193 = vst [vmem:[%s1849_s10 + $0x60] sm:$0xff] %v192_v12  ;;  %195 = vst [vmem:[%s1849_s10 + $0x68] sm:$0xff] %v194_v13  ;;  %v198_v15 = vld [vmem:[%s1844_s9 + $0x78] sm:$0xff]  ;;  %v200_v16 = vld [vmem:[%s1844_s9 + $0x100] sm:$0xff] }
  0x23   : > { %197 = vst [vmem:[%s1849_s10 + $0x70] sm:$0xff] %v196_v14  ;;  %v202_v17 = vld [vmem:[%s1844_s9 + $0x108] sm:$0xff]  ;;  %199 = vst [vmem:[%s1849_s10 + $0x78] sm:$0xff] %v198_v15  ;;  %v204_v18 = vld [vmem:[%s1844_s9 + $0x110] sm:$0xff] }
  0x24   : > { %201 = vst [vmem:[%s1849_s10 + $0x80] sm:$0xff] %v200_v16  ;;  %203 = vst [vmem:[%s1849_s10 + $0x88] sm:$0xff] %v202_v17  ;;  %v206_v19 = vld [vmem:[%s1844_s9 + $0x118] sm:$0xff]  ;;  %v208_v20 = vld [vmem:[%s1844_s9 + $0x120] sm:$0xff] }
  0x25   : > { %205 = vst [vmem:[%s1849_s10 + $0x90] sm:$0xff] %v204_v18  ;;  %207 = vst [vmem:[%s1849_s10 + $0x98] sm:$0xff] %v206_v19  ;;  %v210_v21 = vld [vmem:[%s1844_s9 + $0x128] sm:$0xff]  ;;  %v212_v22 = vld [vmem:[%s1844_s9 + $0x130] sm:$0xff] }
  0x26   : > { %209 = vst [vmem:[%s1849_s10 + $0xa0] sm:$0xff] %v208_v20  ;;  %v214_v23 = vld [vmem:[%s1844_s9 + $0x138] sm:$0xff]  ;;  %211 = vst [vmem:[%s1849_s10 + $0xa8] sm:$0xff] %v210_v21  ;;  %v216_v24 = vld [vmem:[%s1844_s9 + $0x140] sm:$0xff] }
  0x27   : > { %213 = vst [vmem:[%s1849_s10 + $0xb0] sm:$0xff] %v212_v22  ;;  %215 = vst [vmem:[%s1849_s10 + $0xb8] sm:$0xff] %v214_v23  ;;  %v218_v25 = vld [vmem:[%s1844_s9 + $0x148] sm:$0xff]  ;;  %v220_v26 = vld [vmem:[%s1844_s9 + $0x150] sm:$0xff] }
  0x28   : > { %217 = vst [vmem:[%s1849_s10 + $0xc0] sm:$0xff] %v216_v24  ;;  %219 = vst [vmem:[%s1849_s10 + $0xc8] sm:$0xff] %v218_v25  ;;  %v222_v27 = vld [vmem:[%s1844_s9 + $0x158] sm:$0xff]  ;;  %v224_v28 = vld [vmem:[%s1844_s9 + $0x160] sm:$0xff] }
  0x29   : > { %221 = vst [vmem:[%s1849_s10 + $0xd0] sm:$0xff] %v220_v26  ;;  %v226_v29 = vld [vmem:[%s1844_s9 + $0x168] sm:$0xff]  ;;  %223 = vst [vmem:[%s1849_s10 + $0xd8] sm:$0xff] %v222_v27  ;;  %v228_v30 = vld [vmem:[%s1844_s9 + $0x170] sm:$0xff] }
  0x2a   : > { %225 = vst [vmem:[%s1849_s10 + $0xe0] sm:$0xff] %v224_v28  ;;  %227 = vst [vmem:[%s1849_s10 + $0xe8] sm:$0xff] %v226_v29  ;;  %v230_v31 = vld [vmem:[%s1844_s9 + $0x178] sm:$0xff]  ;;  %v232_v32 = vld [vmem:[%s1844_s9 + $0x200] sm:$0xff] }
  0x2b   : > { %229 = vst [vmem:[%s1849_s10 + $0xf0] sm:$0xff] %v228_v30  ;;  %231 = vst [vmem:[%s1849_s10 + $0xf8] sm:$0xff] %v230_v31  ;;  %v234_v33 = vld [vmem:[%s1844_s9 + $0x208] sm:$0xff]  ;;  %v236_v34 = vld [vmem:[%s1844_s9 + $0x210] sm:$0xff] }
  0x2c   : > { %233 = vst [vmem:[%s1849_s10 + $0x100] sm:$0xff] %v232_v32  ;;  %v238_v35 = vld [vmem:[%s1844_s9 + $0x218] sm:$0xff]  ;;  %235 = vst [vmem:[%s1849_s10 + $0x108] sm:$0xff] %v234_v33  ;;  %v240_v36 = vld [vmem:[%s1844_s9 + $0x220] sm:$0xff] }
  0x2d   : > { %237 = vst [vmem:[%s1849_s10 + $0x110] sm:$0xff] %v236_v34  ;;  %239 = vst [vmem:[%s1849_s10 + $0x118] sm:$0xff] %v238_v35  ;;  %v242_v37 = vld [vmem:[%s1844_s9 + $0x228] sm:$0xff]  ;;  %v244_v38 = vld [vmem:[%s1844_s9 + $0x230] sm:$0xff] }
  0x2e   : > { %241 = vst [vmem:[%s1849_s10 + $0x120] sm:$0xff] %v240_v36  ;;  %243 = vst [vmem:[%s1849_s10 + $0x128] sm:$0xff] %v242_v37  ;;  %v246_v39 = vld [vmem:[%s1844_s9 + $0x238] sm:$0xff]  ;;  %v248_v40 = vld [vmem:[%s1844_s9 + $0x240] sm:$0xff] }
  0x2f   : > { %245 = vst [vmem:[%s1849_s10 + $0x130] sm:$0xff] %v244_v38  ;;  %v250_v41 = vld [vmem:[%s1844_s9 + $0x248] sm:$0xff]  ;;  %247 = vst [vmem:[%s1849_s10 + $0x138] sm:$0xff] %v246_v39  ;;  %v252_v42 = vld [vmem:[%s1844_s9 + $0x250] sm:$0xff] }
  0x30   : > { %249 = vst [vmem:[%s1849_s10 + $0x140] sm:$0xff] %v248_v40  ;;  %251 = vst [vmem:[%s1849_s10 + $0x148] sm:$0xff] %v250_v41  ;;  %v254_v43 = vld [vmem:[%s1844_s9 + $0x258] sm:$0xff]  ;;  %v256_v44 = vld [vmem:[%s1844_s9 + $0x260] sm:$0xff] }
  0x31   : > { %253 = vst [vmem:[%s1849_s10 + $0x150] sm:$0xff] %v252_v42  ;;  %255 = vst [vmem:[%s1849_s10 + $0x158] sm:$0xff] %v254_v43  ;;  %v258_v45 = vld [vmem:[%s1844_s9 + $0x268] sm:$0xff]  ;;  %v260_v46 = vld [vmem:[%s1844_s9 + $0x270] sm:$0xff] }
  0x32   : > { %257 = vst [vmem:[%s1849_s10 + $0x160] sm:$0xff] %v256_v44  ;;  %v262_v47 = vld [vmem:[%s1844_s9 + $0x278] sm:$0xff]  ;;  %259 = vst [vmem:[%s1849_s10 + $0x168] sm:$0xff] %v258_v45  ;;  %v264_v48 = vld [vmem:[%s1844_s9 + $0x300] sm:$0xff] }
  0x33   : > { %261 = vst [vmem:[%s1849_s10 + $0x170] sm:$0xff] %v260_v46  ;;  %263 = vst [vmem:[%s1849_s10 + $0x178] sm:$0xff] %v262_v47  ;;  %v266_v49 = vld [vmem:[%s1844_s9 + $0x308] sm:$0xff]  ;;  %v268_v50 = vld [vmem:[%s1844_s9 + $0x310] sm:$0xff] }
  0x34   : > { %265 = vst [vmem:[%s1849_s10 + $0x180] sm:$0xff] %v264_v48  ;;  %267 = vst [vmem:[%s1849_s10 + $0x188] sm:$0xff] %v266_v49  ;;  %v270_v51 = vld [vmem:[%s1844_s9 + $0x318] sm:$0xff]  ;;  %v272_v52 = vld [vmem:[%s1844_s9 + $0x320] sm:$0xff] }
  0x35   : > { %269 = vst [vmem:[%s1849_s10 + $0x190] sm:$0xff] %v268_v50  ;;  %v274_v53 = vld [vmem:[%s1844_s9 + $0x328] sm:$0xff]  ;;  %271 = vst [vmem:[%s1849_s10 + $0x198] sm:$0xff] %v270_v51  ;;  %v276_v54 = vld [vmem:[%s1844_s9 + $0x330] sm:$0xff] }
  0x36   : > { %273 = vst [vmem:[%s1849_s10 + $0x1a0] sm:$0xff] %v272_v52  ;;  %275 = vst [vmem:[%s1849_s10 + $0x1a8] sm:$0xff] %v274_v53  ;;  %v278_v55 = vld [vmem:[%s1844_s9 + $0x338] sm:$0xff]  ;;  %v280_v56 = vld [vmem:[%s1844_s9 + $0x340] sm:$0xff] }
  0x37   : > { %277 = vst [vmem:[%s1849_s10 + $0x1b0] sm:$0xff] %v276_v54  ;;  %279 = vst [vmem:[%s1849_s10 + $0x1b8] sm:$0xff] %v278_v55  ;;  %v282_v57 = vld [vmem:[%s1844_s9 + $0x348] sm:$0xff]  ;;  %v284_v58 = vld [vmem:[%s1844_s9 + $0x350] sm:$0xff] }
  0x38   : > { %281 = vst [vmem:[%s1849_s10 + $0x1c0] sm:$0xff] %v280_v56  ;;  %v286_v59 = vld [vmem:[%s1844_s9 + $0x358] sm:$0xff]  ;;  %283 = vst [vmem:[%s1849_s10 + $0x1c8] sm:$0xff] %v282_v57  ;;  %v288_v60 = vld [vmem:[%s1844_s9 + $0x360] sm:$0xff] }
  0x39   : > { %285 = vst [vmem:[%s1849_s10 + $0x1d0] sm:$0xff] %v284_v58  ;;  %287 = vst [vmem:[%s1849_s10 + $0x1d8] sm:$0xff] %v286_v59  ;;  %v290_v61 = vld [vmem:[%s1844_s9 + $0x368] sm:$0xff]  ;;  %v292_v62 = vld [vmem:[%s1844_s9 + $0x370] sm:$0xff] }
  0x3a   : > { %289 = vst [vmem:[%s1849_s10 + $0x1e0] sm:$0xff] %v288_v60  ;;  %291 = vst [vmem:[%s1849_s10 + $0x1e8] sm:$0xff] %v290_v61  ;;  %v294_v63 = vld [vmem:[%s1844_s9 + $0x378] sm:$0xff] }
  0x3b   : > { %293 = vst [vmem:[%s1849_s10 + $0x1f0] sm:$0xff] %v292_v62  ;;  %295 = vst [vmem:[%s1849_s10 + $0x1f8] sm:$0xff] %v294_v63 }
  0x3c PF: > { %p1594_p9 = scmp.ge.s32.totalorder %s1756_s18, 1  ;;  %p300_p10 = scmp.lt.s32.totalorder %s1756_s18, 5 }
  0x3e   : > { %p301_p11 = pnand %p1594_p9, %p300_p10 }
  0x3f   : > { %s307_s11 = sand.u32 (!%p301_p11), 1, %s1732_s12   ;;  %v1758_v0 = vmov (!%p301_p11), 0   ;;  %v2006_v24 = vld [vmem:[%s2752_s1] sm:$0xff] (!%p301_p11)   ;;  %vm504_vm0 = vcmask (!%p301_p11), 261120   ;;  %v2037_v56 = vld [vmem:[%s2752_s1 + $0x8] sm:$0xff] (!%p301_p11)   ;;  %v2048_v57 = vld [vmem:[%s2752_s1 + $0x10] sm:$0xff] (!%p301_p11)  }
  0x40   : > { %304 = sbr.rel (%p301_p11) target bundleno = 468 (0x1d4), region = 51  ;;  %s1595_s21 = sshll.u32 (!%p301_p11), %s307_s11, 9  ;;  %549 = vmatprep.mubr.bf16.mxu0 (!%p301_p11), %v1758_v0  ;;  %622 = vmatprep.mubr.bf16.mxu1 (!%p301_p11), %v1758_v0  ;;  %v436_v58 = vld [vmem:[%s2753_s2] sm:$0xff] (!%p301_p11)  ;;  %v438_v59 = vld [vmem:[%s2753_s2 + $0x10] sm:$0xff] (!%p301_p11)  ;;  %v437_v60 = vld [vmem:[%s2753_s2 + $0x8] sm:$0xff] (!%p301_p11) }
  0x41   : > { %1696 = vset.pattern.permute.xlu0 (!%p301_p11), %v1758_v0  ;;  %1697 = vset.pattern.permute.xlu1 (!%p301_p11), %v1758_v0  ;;  %s1985_s22 = scalar_lea.vmem (!%p301_p11), [#allocation2], %s1595_s21  ;;  %v439_v61 = vld [vmem:[%s2753_s2 + $0x18] sm:$0xff] (!%p301_p11)  ;;  %v440_v62 = vld [vmem:[%s2753_s2 + $0x20] sm:$0xff] (!%p301_p11) }
  0x42   : > { %v333_v1 = vld [vmem:[%s1985_s22 + $0x8] sm:$0xff] (!%p301_p11)  ;;  %v335_v3 = vld [vmem:[%s1985_s22 + $0x18] sm:$0xff] (!%p301_p11)  ;;  %v332_v6 = vld [vmem:[%s1985_s22] sm:$0xff] (!%p301_p11)  ;;  %446 = vperm.xlu0 (!%p301_p11), %1696, %v436_v58   ;;  %456 = vperm.xlu1 (!%p301_p11), %1697, %v438_v59  }
  0x43   : > { %v349_v2 = vld [vmem:[%s1985_s22 + $0x88] sm:$0xff] (!%p301_p11)  ;;  %v351_v5 = vld [vmem:[%s1985_s22 + $0x98] sm:$0xff] (!%p301_p11)  ;;  %v348_v7 = vld [vmem:[%s1985_s22 + $0x80] sm:$0xff] (!%p301_p11) }
  0x44   : > { %v397_v4 = vpack.c.bf16 (!%p301_p11), %v349_v2, %v333_v1  ;;  %v399_v8 = vpack.c.bf16 (!%p301_p11), %v351_v5, %v335_v3  ;;  %v396_v9 = vpack.c.bf16 (!%p301_p11), %v348_v7, %v332_v6  ;;  %v334_v10 = vld [vmem:[%s1985_s22 + $0x10] sm:$0xff] (!%p301_p11)  ;;  %v365_v12 = vld [vmem:[%s1985_s22 + $0x108] sm:$0xff] (!%p301_p11)  ;;  %v367_v15 = vld [vmem:[%s1985_s22 + $0x118] sm:$0xff] (!%p301_p11) }
  0x45   : > { %v350_v11 = vld [vmem:[%s1985_s22 + $0x90] sm:$0xff] (!%p301_p11)  ;;  %v381_v14 = vld [vmem:[%s1985_s22 + $0x188] sm:$0xff] (!%p301_p11)  ;;  %v383_v16 = vld [vmem:[%s1985_s22 + $0x198] sm:$0xff] (!%p301_p11) }
  0x46   : > { %517 = vmatprep.subr.bf16.mxu0 (!%p301_p11), %v397_v4  ;;  %v398_v13 = vpack.c.bf16 (!%p301_p11), %v350_v11, %v334_v10  ;;  %590 = vmatprep.subr.bf16.mxu1 (!%p301_p11), %v399_v8  ;;  %v413_v17 = vpack.c.bf16 (!%p301_p11), %v381_v14, %v365_v12  ;;  %v415_v18 = vpack.c.bf16 (!%p301_p11), %v383_v16, %v367_v15  ;;  %v364_v19 = vld [vmem:[%s1985_s22 + $0x100] sm:$0xff] (!%p301_p11)  ;;  %v366_v21 = vld [vmem:[%s1985_s22 + $0x110] sm:$0xff] (!%p301_p11)  ;;  %v337_v25 = vld [vmem:[%s1985_s22 + $0x28] sm:$0xff] (!%p301_p11) }
  0x47   : > { %518 = vmatpush1.bf16.msra.mxu0 %v396_v9  ;;  %v380_v20 = vld [vmem:[%s1985_s22 + $0x180] sm:$0xff]  ;;  %v382_v23 = vld [vmem:[%s1985_s22 + $0x190] sm:$0xff]  ;;  %v353_v26 = vld [vmem:[%s1985_s22 + $0xa8] sm:$0xff]  ;;  %451 = vperm.xlu0 %1696, %v437_v60   ;;  %s1634_s12 = sshll.u32 (%p1827_p6), %s1740_s14, 4 }
  0x48   : > { %591 = vmatpush1.bf16.msra.mxu1 %v398_v13  ;;  %v412_v22 = vpack.c.bf16 %v380_v20, %v364_v19  ;;  %519 = vmatprep.subr.bf16.mxu0 %v413_v17  ;;  %v414_v27 = vpack.c.bf16 %v382_v23, %v366_v21  ;;  %v401_v28 = vpack.c.bf16 %v353_v26, %v337_v25  ;;  %v339_v29 = vld [vmem:[%s1985_s22 + $0x38] sm:$0xff]  ;;  %v336_v31 = vld [vmem:[%s1985_s22 + $0x20] sm:$0xff]  ;;  %v338_v34 = vld [vmem:[%s1985_s22 + $0x30] sm:$0xff] }
  0x49   : > { %592 = vmatprep.subr.bf16.mxu1 %v415_v18  ;;  %v355_v30 = vld [vmem:[%s1985_s22 + $0xb8] sm:$0xff]  ;;  %v352_v33 = vld [vmem:[%s1985_s22 + $0xa0] sm:$0xff]  ;;  %v354_v35 = vld [vmem:[%s1985_s22 + $0xb0] sm:$0xff]  ;;  %461 = vperm.xlu1 %1697, %v439_v61  }
  0x4a   : > { %v403_v32 = vpack.c.bf16 %v355_v30, %v339_v29  ;;  %v400_v36 = vpack.c.bf16 %v352_v33, %v336_v31  ;;  %v369_v37 = vld [vmem:[%s1985_s22 + $0x128] sm:$0xff]  ;;  %v402_v38 = vpack.c.bf16 %v354_v35, %v338_v34  ;;  %v371_v40 = vld [vmem:[%s1985_s22 + $0x138] sm:$0xff]  ;;  %v368_v43 = vld [vmem:[%s1985_s22 + $0x120] sm:$0xff] }
  0x4b   : > { %520 = vmatpush1.bf16.msra.mxu0 %v412_v22  ;;  %v385_v39 = vld [vmem:[%s1985_s22 + $0x1a8] sm:$0xff]  ;;  %v387_v41 = vld [vmem:[%s1985_s22 + $0x1b8] sm:$0xff]  ;;  %v384_v44 = vld [vmem:[%s1985_s22 + $0x1a0] sm:$0xff]  ;;  %466 = vperm.xlu0 %1696, %v440_v62  }
  0x4c   : > { %593 = vmatpush1.bf16.msra.mxu1 %v414_v27  ;;  %663 = vmatprep.subr.bf16.mxu0 %v401_v28  ;;  %v417_v42 = vpack.c.bf16 %v385_v39, %v369_v37  ;;  %v370_v45 = vld [vmem:[%s1985_s22 + $0x130] sm:$0xff]  ;;  %v419_v46 = vpack.c.bf16 %v387_v41, %v371_v40  ;;  %v416_v48 = vpack.c.bf16 %v384_v44, %v368_v43  ;;  %v341_v49 = vld [vmem:[%s1985_s22 + $0x48] sm:$0xff]  ;;  %v343_v53 = vld [vmem:[%s1985_s22 + $0x58] sm:$0xff] }
  0x4d   : > { %736 = vmatprep.subr.bf16.mxu1 %v403_v32  ;;  %v386_v47 = vld [vmem:[%s1985_s22 + $0x1b0] sm:$0xff]  ;;  %v357_v50 = vld [vmem:[%s1985_s22 + $0xc8] sm:$0xff]  ;;  %v359_v54 = vld [vmem:[%s1985_s22 + $0xd8] sm:$0xff] }
  0x4e   : > { %1601 = vmatmul.mubr.msk.bf16.vlgmr.msra.gmra.mrb[0].mxu0 %vm504_vm0, %v2006_v24  ;;  %v418_v51 = vpack.c.bf16 %v386_v47, %v370_v45  ;;  %v405_v52 = vpack.c.bf16 %v357_v50, %v341_v49  ;;  %v407_v55 = vpack.c.bf16 %v359_v54, %v343_v53  ;;  %v2074_v63 = vld [vmem:[%s2752_s1 + $0x18] sm:$0xff]   ;;  %v441_v1 = vld [vmem:[%s2753_s2 + $0x28] sm:$0xff]  ;;  %v442_v2 = vld [vmem:[%s2753_s2 + $0x30] sm:$0xff] }
  0x4f   : > { %1605 = vmatmul.mubr.msk.bf16.vlgmr.msra.gmra.mrb[0].mxu1 %vm504_vm0, %v2006_v24  ;;  %664 = vmatpush1.bf16.msra.mxu0 %v400_v36  ;;  %v443_v3 = vld [vmem:[%s2753_s2 + $0x38] sm:$0xff]  ;;  %v340_v4 = vld [vmem:[%s1985_s22 + $0x40] sm:$0xff]  ;;  %v342_v6 = vld [vmem:[%s1985_s22 + $0x50] sm:$0xff] }
  0x50   : > { %737 = vmatpush1.bf16.msra.mxu1 %v402_v38  ;;  %559 = vmatprep.mubr.bf16.mxu0 %v1758_v0  ;;  %v356_v5 = vld [vmem:[%s1985_s22 + $0xc0] sm:$0xff]  ;;  %v358_v7 = vld [vmem:[%s1985_s22 + $0xd0] sm:$0xff]  ;;  %v373_v8 = vld [vmem:[%s1985_s22 + $0x148] sm:$0xff] }
  0x51   : > { %632 = vmatprep.mubr.bf16.mxu1 %v1758_v0  ;;  %665 = vmatprep.subr.bf16.mxu0 %v417_v42  ;;  %v389_v9 = vld [vmem:[%s1985_s22 + $0x1c8] sm:$0xff]  ;;  %v404_v10 = vpack.c.bf16 %v356_v5, %v340_v4  ;;  %v375_v11 = vld [vmem:[%s1985_s22 + $0x158] sm:$0xff]  ;;  %v406_v13 = vpack.c.bf16 %v358_v7, %v342_v6  ;;  %v372_v14 = vld [vmem:[%s1985_s22 + $0x140] sm:$0xff] }
  0x52   : > { %738 = vmatprep.subr.bf16.mxu1 %v419_v46  ;;  %471 = vperm.xlu1 %1697, %v441_v1   ;;  %v391_v12 = vld [vmem:[%s1985_s22 + $0x1d8] sm:$0xff]  ;;  %v388_v15 = vld [vmem:[%s1985_s22 + $0x1c0] sm:$0xff]  ;;  %v374_v16 = vld [vmem:[%s1985_s22 + $0x150] sm:$0xff]  ;;  %v421_v17 = vpack.c.bf16 %v389_v9, %v373_v8 }
  0x53   : > { %666 = vmatpush1.bf16.msra.mxu0 %v416_v48  ;;  %476 = vperm.xlu0 %1696, %v442_v2   ;;  %v390_v18 = vld [vmem:[%s1985_s22 + $0x1d0] sm:$0xff]  ;;  %v345_v19 = vld [vmem:[%s1985_s22 + $0x68] sm:$0xff]  ;;  %v423_v21 = vpack.c.bf16 %v391_v12, %v375_v11  ;;  %v347_v22 = vld [vmem:[%s1985_s22 + $0x78] sm:$0xff]  ;;  %v420_v25 = vpack.c.bf16 %v388_v15, %v372_v14 }
  0x54   : > { %739 = vmatpush1.bf16.msra.mxu1 %v418_v51  ;;  %809 = vmatprep.subr.bf16.mxu0 %v405_v52  ;;  %v361_v20 = vld [vmem:[%s1985_s22 + $0xe8] sm:$0xff]  ;;  %v363_v23 = vld [vmem:[%s1985_s22 + $0xf8] sm:$0xff]  ;;  %v422_v26 = vpack.c.bf16 %v390_v18, %v374_v16  ;;  %v344_v29 = vld [vmem:[%s1985_s22 + $0x60] sm:$0xff] }
  0x55   : > { %882 = vmatprep.subr.bf16.mxu1 %v407_v55  ;;  %v409_v27 = vpack.c.bf16 %v361_v20, %v345_v19  ;;  %v411_v28 = vpack.c.bf16 %v363_v23, %v347_v22  ;;  %v360_v30 = vld [vmem:[%s1985_s22 + $0xe0] sm:$0xff]  ;;  %v346_v31 = vld [vmem:[%s1985_s22 + $0x70] sm:$0xff]  ;;  %v377_v33 = vld [vmem:[%s1985_s22 + $0x168] sm:$0xff] }
  0x56   : > { %1602 = vmatmul.mubr.msk.bf16.gmra.mrb[4].mxu0 %vm504_vm0, %v2037_v56  ;;  %481 = vperm.xlu1 %1697, %v443_v3   ;;  %v362_v32 = vld [vmem:[%s1985_s22 + $0xf0] sm:$0xff]  ;;  %v393_v34 = vld [vmem:[%s1985_s22 + $0x1e8] sm:$0xff]  ;;  %v408_v35 = vpack.c.bf16 %v360_v30, %v344_v29  ;;  %v379_v36 = vld [vmem:[%s1985_s22 + $0x178] sm:$0xff] }
  0x57   : > { %1606 = vmatmul.mubr.msk.bf16.gmra.mrb[4].mxu1 %vm504_vm0, %v2037_v56  ;;  %569 = vmatprep.mubr.bf16.mxu0 %v1758_v0  ;;  %v395_v37 = vld [vmem:[%s1985_s22 + $0x1f8] sm:$0xff]  ;;  %v410_v38 = vpack.c.bf16 %v362_v32, %v346_v31  ;;  %v376_v39 = vld [vmem:[%s1985_s22 + $0x160] sm:$0xff]  ;;  %v425_v41 = vpack.c.bf16 %v393_v34, %v377_v33  ;;  %v378_v42 = vld [vmem:[%s1985_s22 + $0x170] sm:$0xff] }
  0x58   : > { %642 = vmatprep.mubr.bf16.mxu1 %v1758_v0  ;;  %v392_v40 = vld [vmem:[%s1985_s22 + $0x1e0] sm:$0xff]  ;;  %v394_v43 = vld [vmem:[%s1985_s22 + $0x1f0] sm:$0xff]  ;;  %v427_v44 = vpack.c.bf16 %v395_v37, %v379_v36  ;;  %s1596_s22 = sshll.u32 %s307_s11, 10  ;;  %s1635_s11 = sshll.u32 (%p1827_p6), %s1744_s15, 8 }
  0x59   : > { %v424_v45 = vpack.c.bf16 %v392_v40, %v376_v39  ;;  %v426_v46 = vpack.c.bf16 %v394_v43, %v378_v42  ;;  %s2200_s8 = scalar_lea.vmem [#allocation3], %s1596_s22  ;;  %s1238_s23 = sadd.s32 (%p1827_p6), %s1635_s11, %s1634_s12 }
  0x5a   : > { %s1636_s9 = sshll.u32 (%p1827_p6), %s1238_s23, 3 }
  0x5b   : > { %s2481_s24 = scalar_lea.vmem (%p1827_p6), %s2754_s3, %s1636_s9 }
  0x5e   : > { %1603 = vmatmul.mubr.msk.bf16.gmra.mrb[8].mxu0 %vm504_vm0, %v2048_v57 }
  0x5f   : > { %1607 = vmatmul.mubr.msk.bf16.gmra.mrb[8].mxu1 %vm504_vm0, %v2048_v57  ;;  %579 = vmatprep.mubr.bf16.mxu0 %v1758_v0 }
  0x60   : > { %652 = vmatprep.mubr.bf16.mxu1 %v1758_v0 }
  0x66   : > { %1604 = vmatmul.mubr.msk.bf16.gmra.mrb[12].mxu0 %vm504_vm0, %v2074_v63 }
  0x67   : > { %1608 = vmatmul.mubr.msk.bf16.gmra.mrb[12].mxu1 %vm504_vm0, %v2074_v63  ;;  %695 = vmatprep.mubr.bf16.mxu0 %v1758_v0 }
  0x68   : > { %768 = vmatprep.mubr.bf16.mxu1 %v1758_v0 }
  0x6e   : > { %1609 = vmatmul.mubr.msk.bf16.vlgmr.msra.gmra.mrb[16].mxu0 %vm504_vm0, %v2006_v24 }
  0x6f   : > { %1613 = vmatmul.mubr.msk.bf16.vlgmr.msra.gmra.mrb[16].mxu1 %vm504_vm0, %v2006_v24  ;;  %810 = vmatpush1.bf16.msra.mxu0 %v404_v10 }
  0x70   : > { %883 = vmatpush1.bf16.msra.mxu1 %v406_v13  ;;  %705 = vmatprep.mubr.bf16.mxu0 %v1758_v0 }
  0x71   : > { %778 = vmatprep.mubr.bf16.mxu1 %v1758_v0  ;;  %811 = vmatprep.subr.bf16.mxu0 %v421_v17 }
  0x72   : > { %884 = vmatprep.subr.bf16.mxu1 %v423_v21 }
  0x73   : > { %812 = vmatpush1.bf16.msra.mxu0 %v420_v25 }
  0x74   : > { %885 = vmatpush1.bf16.msra.mxu1 %v422_v26  ;;  %955 = vmatprep.subr.bf16.mxu0 %v409_v27 }
  0x75   : > { %1028 = vmatprep.subr.bf16.mxu1 %v411_v28 }
  0x76   : > { %1610 = vmatmul.mubr.msk.bf16.gmra.mrb[20].mxu0 %vm504_vm0, %v2037_v56 }
  0x77   : > { %1614 = vmatmul.mubr.msk.bf16.gmra.mrb[20].mxu1 %vm504_vm0, %v2037_v56  ;;  %715 = vmatprep.mubr.bf16.mxu0 %v1758_v0 }
  0x78   : > { %788 = vmatprep.mubr.bf16.mxu1 %v1758_v0 }
  0x7e   : > { %1611 = vmatmul.mubr.msk.bf16.gmra.mrb[24].mxu0 %vm504_vm0, %v2048_v57 }
  0x7f   : > { %1615 = vmatmul.mubr.msk.bf16.gmra.mrb[24].mxu1 %vm504_vm0, %v2048_v57  ;;  %725 = vmatprep.mubr.bf16.mxu0 %v1758_v0 }
  0x80   : > { %798 = vmatprep.mubr.bf16.mxu1 %v1758_v0 }
  0x86   : > { %1612 = vmatmul.mubr.msk.bf16.gmra.mrb[28].mxu0 %vm504_vm0, %v2074_v63 }
  0x87   : > { %1616 = vmatmul.mubr.msk.bf16.gmra.mrb[28].mxu1 %vm504_vm0, %v2074_v63  ;;  %841 = vmatprep.mubr.bf16.mxu0 %v1758_v0 }
  0x88   : > { %914 = vmatprep.mubr.bf16.mxu1 %v1758_v0 }
  0x8e   : > { %1617 = vmatmul.mubr.msk.bf16.vlgmr.msra.gmra.mrb[32].mxu0 %vm504_vm0, %v2006_v24 }
  0x8f   : > { %1621 = vmatmul.mubr.msk.bf16.vlgmr.msra.gmra.mrb[32].mxu1 %vm504_vm0, %v2006_v24  ;;  %956 = vmatpush1.bf16.msra.mxu0 %v408_v35 }
  0x90   : > { %1029 = vmatpush1.bf16.msra.mxu1 %v410_v38  ;;  %851 = vmatprep.mubr.bf16.mxu0 %v1758_v0 }
  0x91   : > { %924 = vmatprep.mubr.bf16.mxu1 %v1758_v0  ;;  %957 = vmatprep.subr.bf16.mxu0 %v425_v41 }
  0x92   : > { %1030 = vmatprep.subr.bf16.mxu1 %v427_v44 }
  0x93   : > { %958 = vmatpush1.bf16.msra.mxu0 %v424_v45 }
  0x94   : > { %1031 = vmatpush1.bf16.msra.mxu1 %v426_v46 }
  0x96   : > { %1618 = vmatmul.mubr.msk.bf16.gmra.mrb[36].mxu0 %vm504_vm0, %v2037_v56 }
  0x97   : > { %1622 = vmatmul.mubr.msk.bf16.gmra.mrb[36].mxu1 %vm504_vm0, %v2037_v56  ;;  %861 = vmatprep.mubr.bf16.mxu0 %v1758_v0 }
  0x98   : > { %934 = vmatprep.mubr.bf16.mxu1 %v1758_v0 }
  0x9e   : > { %1619 = vmatmul.mubr.msk.bf16.gmra.mrb[40].mxu0 %vm504_vm0, %v2048_v57 }
  0x9f   : > { %1623 = vmatmul.mubr.msk.bf16.gmra.mrb[40].mxu1 %vm504_vm0, %v2048_v57  ;;  %871 = vmatprep.mubr.bf16.mxu0 %v1758_v0 }
  0xa0   : > { %944 = vmatprep.mubr.bf16.mxu1 %v1758_v0 }
  0xa6   : > { %1620 = vmatmul.mubr.msk.bf16.gmra.mrb[44].mxu0 %vm504_vm0, %v2074_v63 }
  0xa7   : > { %1624 = vmatmul.mubr.msk.bf16.gmra.mrb[44].mxu1 %vm504_vm0, %v2074_v63  ;;  %987 = vmatprep.mubr.bf16.mxu0 %v1758_v0 }
  0xa8   : > { %1060 = vmatprep.mubr.bf16.mxu1 %v1758_v0 }
  0xae   : > { %1625 = vmatmul.mubr.msk.bf16.vlgmr.msra.gmra.mrb[48].mxu0 %vm504_vm0, %v2006_v24 }
  0xaf   : > { %1629 = vmatmul.mubr.msk.bf16.vlgmr.msra.gmra.mrb[48].mxu1 %vm504_vm0, %v2006_v24  ;;  %997 = vmatprep.mubr.bf16.mxu0 %v1758_v0 }
  0xb0   : > { %1070 = vmatprep.mubr.bf16.mxu1 %v1758_v0 }
  0xb6   : > { %1626 = vmatmul.mubr.msk.bf16.gmra.mrb[52].mxu0 %vm504_vm0, %v2037_v56 }
  0xb7   : > { %1630 = vmatmul.mubr.msk.bf16.gmra.mrb[52].mxu1 %vm504_vm0, %v2037_v56  ;;  %1007 = vmatprep.mubr.bf16.mxu0 %v1758_v0 }
  0xb8   : > { %1080 = vmatprep.mubr.bf16.mxu1 %v1758_v0 }
  0xbe   : > { %1627 = vmatmul.mubr.msk.bf16.gmra.mrb[56].mxu0 %vm504_vm0, %v2048_v57 }
  0xbf   : > { %1631 = vmatmul.mubr.msk.bf16.gmra.mrb[56].mxu1 %vm504_vm0, %v2048_v57  ;;  %1017 = vmatprep.mubr.bf16.mxu0 %v1758_v0 }
  0xc0   : > { %1090 = vmatprep.mubr.bf16.mxu1 %v1758_v0 }
  0xc1   : > { %v2189_v24 = vpop.permute.xlu0 %446  ;;  %v2193_v47 = vpop.permute.xlu1 %456 }
  0xc6   : > { %1628 = vmatmul.mubr.msk.bf16.gmra.mrb[60].mxu0 %vm504_vm0, %v2074_v63  ;;  %v2195_v49 = vpop.permute.xlu0 %451 }
  0xc7   : > { %1632 = vmatmul.mubr.msk.bf16.gmra.mrb[60].mxu1 %vm504_vm0, %v2074_v63 }
  0xc8   : > { %v2215_v2 = vpop.permute.xlu1 %461 }
  0xca   : > { %v2232_v18 = vpop.permute.xlu0 %466 }
  0xd1   : > { %v2235_v20 = vpop.permute.xlu1 %471 }
  0xd2   : > { %v2252_v37 = vpop.permute.xlu0 %476 }
  0xd5   : > { %v2255_v39 = vpop.permute.xlu1 %481 }
 0x121   : > { %v551_v48 = vpop.f32.mrb[0].mxu0 }
 0x122   : > { %v552_v50 = vadd.f32 %v551_v48, %v2189_v24  ;;  %v624_v51 = vpop.f32.mrb[0].mxu1  ;;  %v553_v52 = vpop.f32.mrb[1].mxu0 }
 0x123   : > { %v625_v0 = vadd.f32 %v624_v51, %v2189_v24  ;;  %v554_v53 = vadd.f32 %v553_v52, %v2189_v24  ;;  %v626_v54 = vpop.f32.mrb[1].mxu1  ;;  %v555_v55 = vpop.f32.mrb[2].mxu0 }
 0x124   : > { %1101 = vst [vmem:[%s2200_s8] sm:$0xff] %v552_v50  ;;  %v627_v56 = vadd.f32 %v626_v54, %v2189_v24  ;;  %v556_v57 = vadd.f32 %v555_v55, %v2195_v49  ;;  %v628_v58 = vpop.f32.mrb[2].mxu1  ;;  %v557_v59 = vpop.f32.mrb[3].mxu0 }
 0x125   : > { %1103 = vst [vmem:[%s2200_s8 + $0x10] sm:$0xff] %v625_v0  ;;  %1102 = vst [vmem:[%s2200_s8 + $0x8] sm:$0xff] %v554_v53  ;;  %v629_v60 = vadd.f32 %v628_v58, %v2195_v49  ;;  %v558_v61 = vadd.f32 %v557_v59, %v2195_v49  ;;  %v630_v62 = vpop.f32.mrb[3].mxu1 }
 0x126   : > { %1104 = vst [vmem:[%s2200_s8 + $0x18] sm:$0xff] %v627_v56  ;;  %1117 = vst [vmem:[%s2200_s8 + $0x80] sm:$0xff] %v556_v57  ;;  %v631_v63 = vadd.f32 %v630_v62, %v2195_v49 }
 0x127   : > { %1119 = vst [vmem:[%s2200_s8 + $0x90] sm:$0xff] %v629_v60  ;;  %1118 = vst [vmem:[%s2200_s8 + $0x88] sm:$0xff] %v558_v61 }
 0x128   : > { %1120 = vst [vmem:[%s2200_s8 + $0x98] sm:$0xff] %v631_v63 }
 0x129   : > { %v561_v1 = vpop.f32.mrb[4].mxu0 }
 0x12a   : > { %v562_v3 = vadd.f32 %v561_v1, %v2193_v47  ;;  %v634_v4 = vpop.f32.mrb[4].mxu1  ;;  %v563_v5 = vpop.f32.mrb[5].mxu0 }
 0x12b   : > { %v635_v6 = vadd.f32 %v634_v4, %v2193_v47  ;;  %v564_v7 = vadd.f32 %v563_v5, %v2193_v47  ;;  %v636_v8 = vpop.f32.mrb[5].mxu1  ;;  %v565_v9 = vpop.f32.mrb[6].mxu0 }
 0x12c   : > { %1133 = vst [vmem:[%s2200_s8 + $0x100] sm:$0xff] %v562_v3  ;;  %v637_v10 = vadd.f32 %v636_v8, %v2193_v47  ;;  %v566_v11 = vadd.f32 %v565_v9, %v2215_v2  ;;  %v638_v12 = vpop.f32.mrb[6].mxu1  ;;  %v567_v13 = vpop.f32.mrb[7].mxu0 }
 0x12d   : > { %1135 = vst [vmem:[%s2200_s8 + $0x110] sm:$0xff] %v635_v6  ;;  %1134 = vst [vmem:[%s2200_s8 + $0x108] sm:$0xff] %v564_v7  ;;  %v639_v14 = vadd.f32 %v638_v12, %v2215_v2  ;;  %v568_v15 = vadd.f32 %v567_v13, %v2215_v2  ;;  %v640_v16 = vpop.f32.mrb[7].mxu1 }
 0x12e   : > { %1136 = vst [vmem:[%s2200_s8 + $0x118] sm:$0xff] %v637_v10  ;;  %1149 = vst [vmem:[%s2200_s8 + $0x180] sm:$0xff] %v566_v11  ;;  %v641_v17 = vadd.f32 %v640_v16, %v2215_v2 }
 0x12f   : > { %1151 = vst [vmem:[%s2200_s8 + $0x190] sm:$0xff] %v639_v14  ;;  %1150 = vst [vmem:[%s2200_s8 + $0x188] sm:$0xff] %v568_v15 }
 0x130   : > { %1152 = vst [vmem:[%s2200_s8 + $0x198] sm:$0xff] %v641_v17 }
 0x131   : > { %v571_v19 = vpop.f32.mrb[8].mxu0 }
 0x132   : > { %v644_v21 = vpop.f32.mrb[8].mxu1  ;;  %v572_v22 = vadd.f32 %v571_v19, %v2232_v18  ;;  %v573_v23 = vpop.f32.mrb[9].mxu0 }
 0x133   : > { %v645_v25 = vadd.f32 %v644_v21, %v2232_v18  ;;  %v574_v26 = vadd.f32 %v573_v23, %v2232_v18  ;;  %v646_v27 = vpop.f32.mrb[9].mxu1  ;;  %v575_v28 = vpop.f32.mrb[10].mxu0 }
 0x134   : > { %1165 = vst [vmem:[%s2200_s8 + $0x200] sm:$0xff] %v572_v22  ;;  %v647_v29 = vadd.f32 %v646_v27, %v2232_v18  ;;  %v576_v30 = vadd.f32 %v575_v28, %v2235_v20  ;;  %v648_v31 = vpop.f32.mrb[10].mxu1  ;;  %v577_v32 = vpop.f32.mrb[11].mxu0 }
 0x135   : > { %1167 = vst [vmem:[%s2200_s8 + $0x210] sm:$0xff] %v645_v25  ;;  %1166 = vst [vmem:[%s2200_s8 + $0x208] sm:$0xff] %v574_v26  ;;  %v649_v33 = vadd.f32 %v648_v31, %v2235_v20  ;;  %v578_v34 = vadd.f32 %v577_v32, %v2235_v20  ;;  %v650_v35 = vpop.f32.mrb[11].mxu1 }
 0x136   : > { %1168 = vst [vmem:[%s2200_s8 + $0x218] sm:$0xff] %v647_v29  ;;  %1181 = vst [vmem:[%s2200_s8 + $0x280] sm:$0xff] %v576_v30  ;;  %v651_v36 = vadd.f32 %v650_v35, %v2235_v20 }
 0x137   : > { %1183 = vst [vmem:[%s2200_s8 + $0x290] sm:$0xff] %v649_v33  ;;  %1182 = vst [vmem:[%s2200_s8 + $0x288] sm:$0xff] %v578_v34 }
 0x138   : > { %1184 = vst [vmem:[%s2200_s8 + $0x298] sm:$0xff] %v651_v36 }
 0x139   : > { %v581_v38 = vpop.f32.mrb[12].mxu0 }
 0x13a   : > { %v654_v40 = vpop.f32.mrb[12].mxu1  ;;  %v582_v41 = vadd.f32 %v581_v38, %v2252_v37  ;;  %v583_v42 = vpop.f32.mrb[13].mxu0 }
 0x13b   : > { %v655_v43 = vadd.f32 %v654_v40, %v2252_v37  ;;  %v584_v44 = vadd.f32 %v583_v42, %v2252_v37  ;;  %v656_v45 = vpop.f32.mrb[13].mxu1  ;;  %v585_v46 = vpop.f32.mrb[14].mxu0 }
 0x13c   : > { %1197 = vst [vmem:[%s2200_s8 + $0x300] sm:$0xff] %v582_v41  ;;  %v657_v48 = vadd.f32 %v656_v45, %v2252_v37  ;;  %v586_v50 = vadd.f32 %v585_v46, %v2255_v39  ;;  %v658_v51 = vpop.f32.mrb[14].mxu1  ;;  %v587_v52 = vpop.f32.mrb[15].mxu0 }
 0x13d   : > { %1199 = vst [vmem:[%s2200_s8 + $0x310] sm:$0xff] %v655_v43  ;;  %1198 = vst [vmem:[%s2200_s8 + $0x308] sm:$0xff] %v584_v44  ;;  %v659_v0 = vadd.f32 %v658_v51, %v2255_v39  ;;  %v588_v53 = vadd.f32 %v587_v52, %v2255_v39  ;;  %v660_v54 = vpop.f32.mrb[15].mxu1 }
 0x13e   : > { %1200 = vst [vmem:[%s2200_s8 + $0x318] sm:$0xff] %v657_v48  ;;  %1213 = vst [vmem:[%s2200_s8 + $0x380] sm:$0xff] %v586_v50  ;;  %v661_v55 = vadd.f32 %v660_v54, %v2255_v39 }
 0x13f   : > { %1215 = vst [vmem:[%s2200_s8 + $0x390] sm:$0xff] %v659_v0  ;;  %1214 = vst [vmem:[%s2200_s8 + $0x388] sm:$0xff] %v588_v53 }
 0x140   : > { %1216 = vst [vmem:[%s2200_s8 + $0x398] sm:$0xff] %v661_v55 }
 0x141   : > { %v697_v56 = vpop.f32.mrb[16].mxu0 }
 0x142   : > { %v698_v57 = vadd.f32 %v697_v56, %v2189_v24  ;;  %v770_v58 = vpop.f32.mrb[16].mxu1  ;;  %v699_v59 = vpop.f32.mrb[17].mxu0 }
 0x143   : > { %v771_v60 = vadd.f32 %v770_v58, %v2189_v24  ;;  %v700_v61 = vadd.f32 %v699_v59, %v2189_v24  ;;  %v772_v62 = vpop.f32.mrb[17].mxu1  ;;  %v701_v63 = vpop.f32.mrb[18].mxu0 }
 0x144   : > { %1105 = vst [vmem:[%s2200_s8 + $0x20] sm:$0xff] %v698_v57  ;;  %v773_v1 = vadd.f32 %v772_v62, %v2189_v24  ;;  %v702_v3 = vadd.f32 %v701_v63, %v2195_v49  ;;  %v774_v4 = vpop.f32.mrb[18].mxu1  ;;  %v703_v5 = vpop.f32.mrb[19].mxu0 }
 0x145   : > { %1107 = vst [vmem:[%s2200_s8 + $0x30] sm:$0xff] %v771_v60  ;;  %1106 = vst [vmem:[%s2200_s8 + $0x28] sm:$0xff] %v700_v61  ;;  %v775_v6 = vadd.f32 %v774_v4, %v2195_v49  ;;  %v704_v7 = vadd.f32 %v703_v5, %v2195_v49  ;;  %v776_v8 = vpop.f32.mrb[19].mxu1 }
 0x146   : > { %1108 = vst [vmem:[%s2200_s8 + $0x38] sm:$0xff] %v773_v1  ;;  %1121 = vst [vmem:[%s2200_s8 + $0xa0] sm:$0xff] %v702_v3  ;;  %v777_v9 = vadd.f32 %v776_v8, %v2195_v49 }
 0x147   : > { %1123 = vst [vmem:[%s2200_s8 + $0xb0] sm:$0xff] %v775_v6  ;;  %1122 = vst [vmem:[%s2200_s8 + $0xa8] sm:$0xff] %v704_v7 }
 0x148   : > { %1124 = vst [vmem:[%s2200_s8 + $0xb8] sm:$0xff] %v777_v9 }
 0x149   : > { %v707_v10 = vpop.f32.mrb[20].mxu0 }
 0x14a   : > { %v708_v11 = vadd.f32 %v707_v10, %v2193_v47  ;;  %v780_v12 = vpop.f32.mrb[20].mxu1  ;;  %v709_v13 = vpop.f32.mrb[21].mxu0 }
 0x14b   : > { %v781_v14 = vadd.f32 %v780_v12, %v2193_v47  ;;  %v710_v15 = vadd.f32 %v709_v13, %v2193_v47  ;;  %v782_v16 = vpop.f32.mrb[21].mxu1  ;;  %v711_v17 = vpop.f32.mrb[22].mxu0 }
 0x14c   : > { %1137 = vst [vmem:[%s2200_s8 + $0x120] sm:$0xff] %v708_v11  ;;  %v783_v19 = vadd.f32 %v782_v16, %v2193_v47  ;;  %v712_v21 = vadd.f32 %v711_v17, %v2215_v2  ;;  %v784_v22 = vpop.f32.mrb[22].mxu1  ;;  %v713_v23 = vpop.f32.mrb[23].mxu0 }
 0x14d   : > { %1139 = vst [vmem:[%s2200_s8 + $0x130] sm:$0xff] %v781_v14  ;;  %1138 = vst [vmem:[%s2200_s8 + $0x128] sm:$0xff] %v710_v15  ;;  %v785_v25 = vadd.f32 %v784_v22, %v2215_v2  ;;  %v714_v26 = vadd.f32 %v713_v23, %v2215_v2  ;;  %v786_v27 = vpop.f32.mrb[23].mxu1 }
 0x14e   : > { %1140 = vst [vmem:[%s2200_s8 + $0x138] sm:$0xff] %v783_v19  ;;  %1153 = vst [vmem:[%s2200_s8 + $0x1a0] sm:$0xff] %v712_v21  ;;  %v787_v28 = vadd.f32 %v786_v27, %v2215_v2 }
 0x14f   : > { %1155 = vst [vmem:[%s2200_s8 + $0x1b0] sm:$0xff] %v785_v25  ;;  %1154 = vst [vmem:[%s2200_s8 + $0x1a8] sm:$0xff] %v714_v26 }
 0x150   : > { %1156 = vst [vmem:[%s2200_s8 + $0x1b8] sm:$0xff] %v787_v28 }
 0x151   : > { %v717_v29 = vpop.f32.mrb[24].mxu0 }
 0x152   : > { %v718_v30 = vadd.f32 %v717_v29, %v2232_v18  ;;  %v790_v31 = vpop.f32.mrb[24].mxu1  ;;  %v719_v32 = vpop.f32.mrb[25].mxu0 }
 0x153   : > { %v791_v33 = vadd.f32 %v790_v31, %v2232_v18  ;;  %v720_v34 = vadd.f32 %v719_v32, %v2232_v18  ;;  %v792_v35 = vpop.f32.mrb[25].mxu1  ;;  %v721_v36 = vpop.f32.mrb[26].mxu0 }
 0x154   : > { %1169 = vst [vmem:[%s2200_s8 + $0x220] sm:$0xff] %v718_v30  ;;  %v793_v38 = vadd.f32 %v792_v35, %v2232_v18  ;;  %v722_v40 = vadd.f32 %v721_v36, %v2235_v20  ;;  %v794_v41 = vpop.f32.mrb[26].mxu1  ;;  %v723_v42 = vpop.f32.mrb[27].mxu0 }
 0x155   : > { %1171 = vst [vmem:[%s2200_s8 + $0x230] sm:$0xff] %v791_v33  ;;  %1170 = vst [vmem:[%s2200_s8 + $0x228] sm:$0xff] %v720_v34  ;;  %v795_v43 = vadd.f32 %v794_v41, %v2235_v20  ;;  %v724_v44 = vadd.f32 %v723_v42, %v2235_v20  ;;  %v796_v45 = vpop.f32.mrb[27].mxu1 }
 0x156   : > { %1172 = vst [vmem:[%s2200_s8 + $0x238] sm:$0xff] %v793_v38  ;;  %1185 = vst [vmem:[%s2200_s8 + $0x2a0] sm:$0xff] %v722_v40  ;;  %v797_v46 = vadd.f32 %v796_v45, %v2235_v20 }
 0x157   : > { %1187 = vst [vmem:[%s2200_s8 + $0x2b0] sm:$0xff] %v795_v43  ;;  %1186 = vst [vmem:[%s2200_s8 + $0x2a8] sm:$0xff] %v724_v44 }
 0x158   : > { %1188 = vst [vmem:[%s2200_s8 + $0x2b8] sm:$0xff] %v797_v46 }
 0x159   : > { %v727_v48 = vpop.f32.mrb[28].mxu0 }
 0x15a   : > { %v728_v50 = vadd.f32 %v727_v48, %v2252_v37  ;;  %v800_v51 = vpop.f32.mrb[28].mxu1  ;;  %v729_v52 = vpop.f32.mrb[29].mxu0 }
 0x15b   : > { %v801_v0 = vadd.f32 %v800_v51, %v2252_v37  ;;  %v730_v53 = vadd.f32 %v729_v52, %v2252_v37  ;;  %v802_v54 = vpop.f32.mrb[29].mxu1  ;;  %v731_v55 = vpop.f32.mrb[30].mxu0 }
 0x15c   : > { %1201 = vst [vmem:[%s2200_s8 + $0x320] sm:$0xff] %v728_v50  ;;  %v803_v56 = vadd.f32 %v802_v54, %v2252_v37  ;;  %v732_v57 = vadd.f32 %v731_v55, %v2255_v39  ;;  %v804_v58 = vpop.f32.mrb[30].mxu1  ;;  %v733_v59 = vpop.f32.mrb[31].mxu0 }
 0x15d   : > { %1203 = vst [vmem:[%s2200_s8 + $0x330] sm:$0xff] %v801_v0  ;;  %1202 = vst [vmem:[%s2200_s8 + $0x328] sm:$0xff] %v730_v53  ;;  %v805_v60 = vadd.f32 %v804_v58, %v2255_v39  ;;  %v734_v61 = vadd.f32 %v733_v59, %v2255_v39  ;;  %v806_v62 = vpop.f32.mrb[31].mxu1 }
 0x15e   : > { %1204 = vst [vmem:[%s2200_s8 + $0x338] sm:$0xff] %v803_v56  ;;  %1217 = vst [vmem:[%s2200_s8 + $0x3a0] sm:$0xff] %v732_v57  ;;  %v807_v63 = vadd.f32 %v806_v62, %v2255_v39 }
 0x15f   : > { %1219 = vst [vmem:[%s2200_s8 + $0x3b0] sm:$0xff] %v805_v60  ;;  %1218 = vst [vmem:[%s2200_s8 + $0x3a8] sm:$0xff] %v734_v61 }
 0x160   : > { %1220 = vst [vmem:[%s2200_s8 + $0x3b8] sm:$0xff] %v807_v63 }
 0x161   : > { %v843_v1 = vpop.f32.mrb[32].mxu0 }
 0x162   : > { %v844_v3 = vadd.f32 %v843_v1, %v2189_v24  ;;  %v916_v4 = vpop.f32.mrb[32].mxu1  ;;  %v845_v5 = vpop.f32.mrb[33].mxu0 }
 0x163   : > { %v917_v6 = vadd.f32 %v916_v4, %v2189_v24  ;;  %v846_v7 = vadd.f32 %v845_v5, %v2189_v24  ;;  %v918_v8 = vpop.f32.mrb[33].mxu1  ;;  %v847_v9 = vpop.f32.mrb[34].mxu0 }
 0x164   : > { %1109 = vst [vmem:[%s2200_s8 + $0x40] sm:$0xff] %v844_v3  ;;  %v919_v10 = vadd.f32 %v918_v8, %v2189_v24  ;;  %v848_v11 = vadd.f32 %v847_v9, %v2195_v49  ;;  %v920_v12 = vpop.f32.mrb[34].mxu1  ;;  %v849_v13 = vpop.f32.mrb[35].mxu0 }
 0x165   : > { %1111 = vst [vmem:[%s2200_s8 + $0x50] sm:$0xff] %v917_v6  ;;  %1110 = vst [vmem:[%s2200_s8 + $0x48] sm:$0xff] %v846_v7  ;;  %v921_v14 = vadd.f32 %v920_v12, %v2195_v49  ;;  %v850_v15 = vadd.f32 %v849_v13, %v2195_v49  ;;  %v922_v16 = vpop.f32.mrb[35].mxu1 }
 0x166   : > { %1112 = vst [vmem:[%s2200_s8 + $0x58] sm:$0xff] %v919_v10  ;;  %1125 = vst [vmem:[%s2200_s8 + $0xc0] sm:$0xff] %v848_v11  ;;  %v923_v17 = vadd.f32 %v922_v16, %v2195_v49 }
 0x167   : > { %1127 = vst [vmem:[%s2200_s8 + $0xd0] sm:$0xff] %v921_v14  ;;  %1126 = vst [vmem:[%s2200_s8 + $0xc8] sm:$0xff] %v850_v15 }
 0x168   : > { %1128 = vst [vmem:[%s2200_s8 + $0xd8] sm:$0xff] %v923_v17 }
 0x169   : > { %v853_v19 = vpop.f32.mrb[36].mxu0 }
 0x16a   : > { %v854_v21 = vadd.f32 %v853_v19, %v2193_v47  ;;  %v926_v22 = vpop.f32.mrb[36].mxu1  ;;  %v855_v23 = vpop.f32.mrb[37].mxu0 }
 0x16b   : > { %v927_v25 = vadd.f32 %v926_v22, %v2193_v47  ;;  %v856_v26 = vadd.f32 %v855_v23, %v2193_v47  ;;  %v928_v27 = vpop.f32.mrb[37].mxu1  ;;  %v857_v28 = vpop.f32.mrb[38].mxu0 }
 0x16c   : > { %1141 = vst [vmem:[%s2200_s8 + $0x140] sm:$0xff] %v854_v21  ;;  %v929_v29 = vadd.f32 %v928_v27, %v2193_v47  ;;  %v858_v30 = vadd.f32 %v857_v28, %v2215_v2  ;;  %v930_v31 = vpop.f32.mrb[38].mxu1  ;;  %v859_v32 = vpop.f32.mrb[39].mxu0 }
 0x16d   : > { %1143 = vst [vmem:[%s2200_s8 + $0x150] sm:$0xff] %v927_v25  ;;  %1142 = vst [vmem:[%s2200_s8 + $0x148] sm:$0xff] %v856_v26  ;;  %v931_v33 = vadd.f32 %v930_v31, %v2215_v2  ;;  %v860_v34 = vadd.f32 %v859_v32, %v2215_v2  ;;  %v932_v35 = vpop.f32.mrb[39].mxu1 }
 0x16e   : > { %1144 = vst [vmem:[%s2200_s8 + $0x158] sm:$0xff] %v929_v29  ;;  %1157 = vst [vmem:[%s2200_s8 + $0x1c0] sm:$0xff] %v858_v30  ;;  %v933_v36 = vadd.f32 %v932_v35, %v2215_v2 }
 0x16f   : > { %1159 = vst [vmem:[%s2200_s8 + $0x1d0] sm:$0xff] %v931_v33  ;;  %1158 = vst [vmem:[%s2200_s8 + $0x1c8] sm:$0xff] %v860_v34 }
 0x170   : > { %1160 = vst [vmem:[%s2200_s8 + $0x1d8] sm:$0xff] %v933_v36 }
 0x171   : > { %v863_v38 = vpop.f32.mrb[40].mxu0 }
 0x172   : > { %v864_v40 = vadd.f32 %v863_v38, %v2232_v18  ;;  %v936_v41 = vpop.f32.mrb[40].mxu1  ;;  %v865_v42 = vpop.f32.mrb[41].mxu0 }
 0x173   : > { %v937_v43 = vadd.f32 %v936_v41, %v2232_v18  ;;  %v866_v44 = vadd.f32 %v865_v42, %v2232_v18  ;;  %v938_v45 = vpop.f32.mrb[41].mxu1  ;;  %v867_v46 = vpop.f32.mrb[42].mxu0 }
 0x174   : > { %1173 = vst [vmem:[%s2200_s8 + $0x240] sm:$0xff] %v864_v40  ;;  %v939_v48 = vadd.f32 %v938_v45, %v2232_v18  ;;  %v868_v50 = vadd.f32 %v867_v46, %v2235_v20  ;;  %v940_v51 = vpop.f32.mrb[42].mxu1  ;;  %v869_v52 = vpop.f32.mrb[43].mxu0 }
 0x175   : > { %1175 = vst [vmem:[%s2200_s8 + $0x250] sm:$0xff] %v937_v43  ;;  %1174 = vst [vmem:[%s2200_s8 + $0x248] sm:$0xff] %v866_v44  ;;  %v941_v0 = vadd.f32 %v940_v51, %v2235_v20  ;;  %v870_v53 = vadd.f32 %v869_v52, %v2235_v20  ;;  %v942_v54 = vpop.f32.mrb[43].mxu1 }
 0x176   : > { %1176 = vst [vmem:[%s2200_s8 + $0x258] sm:$0xff] %v939_v48  ;;  %1189 = vst [vmem:[%s2200_s8 + $0x2c0] sm:$0xff] %v868_v50  ;;  %v943_v55 = vadd.f32 %v942_v54, %v2235_v20 }
 0x177   : > { %1191 = vst [vmem:[%s2200_s8 + $0x2d0] sm:$0xff] %v941_v0  ;;  %1190 = vst [vmem:[%s2200_s8 + $0x2c8] sm:$0xff] %v870_v53 }
 0x178   : > { %1192 = vst [vmem:[%s2200_s8 + $0x2d8] sm:$0xff] %v943_v55 }
 0x179   : > { %v873_v56 = vpop.f32.mrb[44].mxu0 }
 0x17a   : > { %v874_v57 = vadd.f32 %v873_v56, %v2252_v37  ;;  %v946_v58 = vpop.f32.mrb[44].mxu1  ;;  %v875_v59 = vpop.f32.mrb[45].mxu0 }
 0x17b   : > { %v947_v60 = vadd.f32 %v946_v58, %v2252_v37  ;;  %v876_v61 = vadd.f32 %v875_v59, %v2252_v37  ;;  %v948_v62 = vpop.f32.mrb[45].mxu1  ;;  %v877_v63 = vpop.f32.mrb[46].mxu0 }
 0x17c   : > { %1205 = vst [vmem:[%s2200_s8 + $0x340] sm:$0xff] %v874_v57  ;;  %v949_v1 = vadd.f32 %v948_v62, %v2252_v37  ;;  %v878_v3 = vadd.f32 %v877_v63, %v2255_v39  ;;  %v950_v4 = vpop.f32.mrb[46].mxu1  ;;  %v879_v5 = vpop.f32.mrb[47].mxu0 }
 0x17d   : > { %1207 = vst [vmem:[%s2200_s8 + $0x350] sm:$0xff] %v947_v60  ;;  %1206 = vst [vmem:[%s2200_s8 + $0x348] sm:$0xff] %v876_v61  ;;  %v951_v6 = vadd.f32 %v950_v4, %v2255_v39  ;;  %v880_v7 = vadd.f32 %v879_v5, %v2255_v39  ;;  %v952_v8 = vpop.f32.mrb[47].mxu1 }
 0x17e   : > { %1208 = vst [vmem:[%s2200_s8 + $0x358] sm:$0xff] %v949_v1  ;;  %1221 = vst [vmem:[%s2200_s8 + $0x3c0] sm:$0xff] %v878_v3  ;;  %v953_v9 = vadd.f32 %v952_v8, %v2255_v39 }
 0x17f   : > { %1223 = vst [vmem:[%s2200_s8 + $0x3d0] sm:$0xff] %v951_v6  ;;  %1222 = vst [vmem:[%s2200_s8 + $0x3c8] sm:$0xff] %v880_v7 }
 0x180   : > { %1224 = vst [vmem:[%s2200_s8 + $0x3d8] sm:$0xff] %v953_v9 }
 0x181   : > { %v989_v10 = vpop.f32.mrb[48].mxu0 }
 0x182   : > { %v990_v11 = vadd.f32 %v989_v10, %v2189_v24  ;;  %v1062_v12 = vpop.f32.mrb[48].mxu1  ;;  %v991_v13 = vpop.f32.mrb[49].mxu0 }
 0x183   : > { %v1063_v14 = vadd.f32 %v1062_v12, %v2189_v24  ;;  %v992_v15 = vadd.f32 %v991_v13, %v2189_v24  ;;  %v1064_v16 = vpop.f32.mrb[49].mxu1  ;;  %v993_v17 = vpop.f32.mrb[50].mxu0  ;;  %v1257_v12 = vld [vmem:[%s2200_s8 + $0x10] sm:$0xff] (%p1827_p6)  ;;  %v1259_v13 = vld [vmem:[%s2200_s8 + $0x18] sm:$0xff] (%p1827_p6) }
 0x184   : > { %1113 = vst [vmem:[%s2200_s8 + $0x60] sm:$0xff] %v990_v11  ;;  %v1065_v19 = vadd.f32 %v1064_v16, %v2189_v24  ;;  %v994_v21 = vadd.f32 %v993_v17, %v2195_v49  ;;  %v1066_v22 = vpop.f32.mrb[50].mxu1  ;;  %v995_v23 = vpop.f32.mrb[51].mxu0  ;;  %v1265_v16 = vld [vmem:[%s2200_s8 + $0x30] sm:$0xff] (%p1827_p6)  ;;  %v1267_v17 = vld [vmem:[%s2200_s8 + $0x38] sm:$0xff] (%p1827_p6)  ;;  %1258 = vst [vmem:[%s2481_s24 + $0x10] sm:$0xff] (%p1827_p6), %v1257_v12 }
 0x185   : > { %1115 = vst [vmem:[%s2200_s8 + $0x70] sm:$0xff] %v1063_v14  ;;  %1114 = vst [vmem:[%s2200_s8 + $0x68] sm:$0xff] %v992_v15  ;;  %v1067_v25 = vadd.f32 %v1066_v22, %v2195_v49  ;;  %v996_v26 = vadd.f32 %v995_v23, %v2195_v49  ;;  %v1068_v27 = vpop.f32.mrb[51].mxu1  ;;  %v1261_v14 = vld [vmem:[%s2200_s8 + $0x20] sm:$0xff] (%p1827_p6)  ;;  %v1263_v15 = vld [vmem:[%s2200_s8 + $0x28] sm:$0xff] (%p1827_p6) }
 0x186   : > { %1116 = vst [vmem:[%s2200_s8 + $0x78] sm:$0xff] %v1065_v19  ;;  %1129 = vst [vmem:[%s2200_s8 + $0xe0] sm:$0xff] %v994_v21  ;;  %v1069_v28 = vadd.f32 %v1068_v27, %v2195_v49  ;;  %v1269_v19 = vld [vmem:[%s2200_s8 + $0x40] sm:$0xff] (%p1827_p6)  ;;  %v1271_v21 = vld [vmem:[%s2200_s8 + $0x48] sm:$0xff] (%p1827_p6) }
 0x187   : > { %1131 = vst [vmem:[%s2200_s8 + $0xf0] sm:$0xff] %v1067_v25  ;;  %1130 = vst [vmem:[%s2200_s8 + $0xe8] sm:$0xff] %v996_v26  ;;  %v1273_v22 = vld [vmem:[%s2200_s8 + $0x50] sm:$0xff] (%p1827_p6)  ;;  %v1275_v23 = vld [vmem:[%s2200_s8 + $0x58] sm:$0xff] (%p1827_p6) }
 0x188   : > { %1132 = vst [vmem:[%s2200_s8 + $0xf8] sm:$0xff] %v1069_v28  ;;  %1260 = vst [vmem:[%s2481_s24 + $0x18] sm:$0xff] (%p1827_p6), %v1259_v13  ;;  %v1385_v12 = vld [vmem:[%s2200_s8 + $0x210] sm:$0xff] (%p1827_p6)  ;;  %v1387_v13 = vld [vmem:[%s2200_s8 + $0x218] sm:$0xff] (%p1827_p6) }
 0x189   : > { %v999_v24 = vpop.f32.mrb[52].mxu0  ;;  %1262 = vst [vmem:[%s2481_s24 + $0x20] sm:$0xff] (%p1827_p6), %v1261_v14  ;;  %1264 = vst [vmem:[%s2481_s24 + $0x28] sm:$0xff] (%p1827_p6), %v1263_v15  ;;  %v1389_v14 = vld [vmem:[%s2200_s8 + $0x220] sm:$0xff] (%p1827_p6)  ;;  %v1391_v15 = vld [vmem:[%s2200_s8 + $0x228] sm:$0xff] (%p1827_p6) }
 0x18a   : > { %v1000_v29 = vadd.f32 %v999_v24, %v2193_v47  ;;  %v1072_v30 = vpop.f32.mrb[52].mxu1  ;;  %v1001_v31 = vpop.f32.mrb[53].mxu0  ;;  %1266 = vst [vmem:[%s2481_s24 + $0x30] sm:$0xff] (%p1827_p6), %v1265_v16  ;;  %1268 = vst [vmem:[%s2481_s24 + $0x38] sm:$0xff] (%p1827_p6), %v1267_v17  ;;  %v1285_v24 = vld [vmem:[%s2200_s8 + $0x80] sm:$0xff] (%p1827_p6)  ;;  %v1393_v16 = vld [vmem:[%s2200_s8 + $0x230] sm:$0xff] (%p1827_p6) }
 0x18b   : > { %v1073_v32 = vadd.f32 %v1072_v30, %v2193_v47  ;;  %v1002_v33 = vadd.f32 %v1001_v31, %v2193_v47  ;;  %v1074_v34 = vpop.f32.mrb[53].mxu1  ;;  %v1003_v49 = vpop.f32.mrb[54].mxu0  ;;  %1270 = vst [vmem:[%s2481_s24 + $0x40] sm:$0xff] (%p1827_p6), %v1269_v19  ;;  %1272 = vst [vmem:[%s2481_s24 + $0x48] sm:$0xff] (%p1827_p6), %v1271_v21  ;;  %v1277_v25 = vld [vmem:[%s2200_s8 + $0x60] sm:$0xff] (%p1827_p6)  ;;  %v1289_v30 = vld [vmem:[%s2200_s8 + $0x90] sm:$0xff] (%p1827_p6) }
 0x18c   : > { %1145 = vst [vmem:[%s2200_s8 + $0x160] sm:$0xff] %v1000_v29  ;;  %v1075_v35 = vadd.f32 %v1074_v34, %v2193_v47  ;;  %v1004_v36 = vadd.f32 %v1003_v49, %v2215_v2  ;;  %v1076_v38 = vpop.f32.mrb[54].mxu1  ;;  %v1005_v40 = vpop.f32.mrb[55].mxu0  ;;  %1274 = vst [vmem:[%s2481_s24 + $0x50] sm:$0xff] (%p1827_p6), %v1273_v22  ;;  %v1279_v26 = vld [vmem:[%s2200_s8 + $0x68] sm:$0xff] (%p1827_p6)  ;;  %v1281_v27 = vld [vmem:[%s2200_s8 + $0x70] sm:$0xff] (%p1827_p6) }
 0x18d   : > { %1147 = vst [vmem:[%s2200_s8 + $0x170] sm:$0xff] %v1073_v32  ;;  %1146 = vst [vmem:[%s2200_s8 + $0x168] sm:$0xff] %v1002_v33  ;;  %v1077_v41 = vadd.f32 %v1076_v38, %v2215_v2  ;;  %v1006_v42 = vadd.f32 %v1005_v40, %v2215_v2  ;;  %v1078_v43 = vpop.f32.mrb[55].mxu1  ;;  %v1283_v28 = vld [vmem:[%s2200_s8 + $0x78] sm:$0xff] (%p1827_p6)  ;;  %v1287_v29 = vld [vmem:[%s2200_s8 + $0x88] sm:$0xff] (%p1827_p6) }
 0x18e   : > { %1148 = vst [vmem:[%s2200_s8 + $0x178] sm:$0xff] %v1075_v35  ;;  %1161 = vst [vmem:[%s2200_s8 + $0x1e0] sm:$0xff] %v1004_v36  ;;  %v1079_v44 = vadd.f32 %v1078_v43, %v2215_v2  ;;  %v1291_v31 = vld [vmem:[%s2200_s8 + $0x98] sm:$0xff] (%p1827_p6)  ;;  %v1293_v32 = vld [vmem:[%s2200_s8 + $0xa0] sm:$0xff] (%p1827_p6) }
 0x18f   : > { %1163 = vst [vmem:[%s2200_s8 + $0x1f0] sm:$0xff] %v1077_v41  ;;  %1162 = vst [vmem:[%s2200_s8 + $0x1e8] sm:$0xff] %v1006_v42  ;;  %v1295_v33 = vld [vmem:[%s2200_s8 + $0xa8] sm:$0xff] (%p1827_p6)  ;;  %v1297_v34 = vld [vmem:[%s2200_s8 + $0xb0] sm:$0xff] (%p1827_p6) }
 0x190   : > { %1164 = vst [vmem:[%s2200_s8 + $0x1f8] sm:$0xff] %v1079_v44  ;;  %1276 = vst [vmem:[%s2481_s24 + $0x58] sm:$0xff] (%p1827_p6), %v1275_v23  ;;  %v1299_v49 = vld [vmem:[%s2200_s8 + $0xb8] sm:$0xff] (%p1827_p6)  ;;  %v1301_v35 = vld [vmem:[%s2200_s8 + $0xc0] sm:$0xff] (%p1827_p6) }
 0x191   : > { %v1009_v47 = vpop.f32.mrb[56].mxu0  ;;  %1278 = vst [vmem:[%s2481_s24 + $0x60] sm:$0xff] (%p1827_p6), %v1277_v25  ;;  %1280 = vst [vmem:[%s2481_s24 + $0x68] sm:$0xff] (%p1827_p6), %v1279_v26  ;;  %v1303_v36 = vld [vmem:[%s2200_s8 + $0xc8] sm:$0xff] (%p1827_p6)  ;;  %v1305_v38 = vld [vmem:[%s2200_s8 + $0xd0] sm:$0xff] (%p1827_p6) }
 0x192   : > { %v1010_v45 = vadd.f32 %v1009_v47, %v2232_v18  ;;  %v1082_v46 = vpop.f32.mrb[56].mxu1  ;;  %v1011_v48 = vpop.f32.mrb[57].mxu0  ;;  %1282 = vst [vmem:[%s2481_s24 + $0x70] sm:$0xff] (%p1827_p6), %v1281_v27  ;;  %1284 = vst [vmem:[%s2481_s24 + $0x78] sm:$0xff] (%p1827_p6), %v1283_v28  ;;  %v1307_v40 = vld [vmem:[%s2200_s8 + $0xd8] sm:$0xff] (%p1827_p6)  ;;  %v1309_v41 = vld [vmem:[%s2200_s8 + $0xe0] sm:$0xff] (%p1827_p6) }
 0x193   : > { %v1083_v50 = vadd.f32 %v1082_v46, %v2232_v18  ;;  %v1012_v51 = vadd.f32 %v1011_v48, %v2232_v18  ;;  %v1084_v52 = vpop.f32.mrb[57].mxu1  ;;  %v1013_v2 = vpop.f32.mrb[58].mxu0  ;;  %1286 = vst [vmem:[%s2481_s24 + $0x100] sm:$0xff] (%p1827_p6), %v1285_v24  ;;  %1288 = vst [vmem:[%s2481_s24 + $0x108] sm:$0xff] (%p1827_p6), %v1287_v29  ;;  %v1311_v42 = vld [vmem:[%s2200_s8 + $0xe8] sm:$0xff] (%p1827_p6)  ;;  %v1313_v43 = vld [vmem:[%s2200_s8 + $0xf0] sm:$0xff] (%p1827_p6) }
 0x194   : > { %1177 = vst [vmem:[%s2200_s8 + $0x260] sm:$0xff] %v1010_v45  ;;  %v1085_v0 = vadd.f32 %v1084_v52, %v2232_v18  ;;  %v1014_v53 = vadd.f32 %v1013_v2, %v2235_v20  ;;  %v1086_v54 = vpop.f32.mrb[58].mxu1  ;;  %v1015_v55 = vpop.f32.mrb[59].mxu0  ;;  %1290 = vst [vmem:[%s2481_s24 + $0x110] sm:$0xff] (%p1827_p6), %v1289_v30  ;;  %v1315_v44 = vld [vmem:[%s2200_s8 + $0xf8] sm:$0xff] (%p1827_p6)  ;;  %v1317_v47 = vld [vmem:[%s2200_s8 + $0x100] sm:$0xff] (%p1827_p6) }
 0x195   : > { %1179 = vst [vmem:[%s2200_s8 + $0x270] sm:$0xff] %v1083_v50  ;;  %1178 = vst [vmem:[%s2200_s8 + $0x268] sm:$0xff] %v1012_v51  ;;  %v1087_v56 = vadd.f32 %v1086_v54, %v2235_v20  ;;  %v1016_v57 = vadd.f32 %v1015_v55, %v2235_v20  ;;  %v1088_v58 = vpop.f32.mrb[59].mxu1  ;;  %v1319_v45 = vld [vmem:[%s2200_s8 + $0x108] sm:$0xff] (%p1827_p6)  ;;  %v1321_v46 = vld [vmem:[%s2200_s8 + $0x110] sm:$0xff] (%p1827_p6) }
 0x196   : > { %1180 = vst [vmem:[%s2200_s8 + $0x278] sm:$0xff] %v1085_v0  ;;  %1193 = vst [vmem:[%s2200_s8 + $0x2e0] sm:$0xff] %v1014_v53  ;;  %v1089_v59 = vadd.f32 %v1088_v58, %v2235_v20  ;;  %v1323_v48 = vld [vmem:[%s2200_s8 + $0x118] sm:$0xff] (%p1827_p6)  ;;  %v1325_v50 = vld [vmem:[%s2200_s8 + $0x120] sm:$0xff] (%p1827_p6) }
 0x197   : > { %1195 = vst [vmem:[%s2200_s8 + $0x2f0] sm:$0xff] %v1087_v56  ;;  %1194 = vst [vmem:[%s2200_s8 + $0x2e8] sm:$0xff] %v1016_v57  ;;  %v1327_v51 = vld [vmem:[%s2200_s8 + $0x128] sm:$0xff] (%p1827_p6)  ;;  %v1329_v52 = vld [vmem:[%s2200_s8 + $0x130] sm:$0xff] (%p1827_p6) }
 0x198   : > { %1196 = vst [vmem:[%s2200_s8 + $0x2f8] sm:$0xff] %v1089_v59  ;;  %1292 = vst [vmem:[%s2481_s24 + $0x118] sm:$0xff] (%p1827_p6), %v1291_v31  ;;  %v1331_v2 = vld [vmem:[%s2200_s8 + $0x138] sm:$0xff] (%p1827_p6)  ;;  %v1333_v0 = vld [vmem:[%s2200_s8 + $0x140] sm:$0xff] (%p1827_p6) }
 0x199   : > { %v1019_v18 = vpop.f32.mrb[60].mxu0  ;;  %1294 = vst [vmem:[%s2481_s24 + $0x120] sm:$0xff] (%p1827_p6), %v1293_v32  ;;  %1296 = vst [vmem:[%s2481_s24 + $0x128] sm:$0xff] (%p1827_p6), %v1295_v33  ;;  %v1335_v53 = vld [vmem:[%s2200_s8 + $0x148] sm:$0xff] (%p1827_p6)  ;;  %v1337_v54 = vld [vmem:[%s2200_s8 + $0x150] sm:$0xff] (%p1827_p6) }
 0x19a   : > { %v1020_v60 = vadd.f32 %v1019_v18, %v2252_v37  ;;  %v1092_v61 = vpop.f32.mrb[60].mxu1  ;;  %v1021_v62 = vpop.f32.mrb[61].mxu0  ;;  %1235 = sbr.rel (!%p1827_p6) target bundleno = 468 (0x1d4), region = 59  ;;  %1298 = vst [vmem:[%s2481_s24 + $0x130] sm:$0xff] (%p1827_p6), %v1297_v34  ;;  %1300 = vst [vmem:[%s2481_s24 + $0x138] sm:$0xff] (%p1827_p6), %v1299_v49  ;;  %v1339_v55 = vld [vmem:[%s2200_s8 + $0x158] sm:$0xff] (%p1827_p6) }
 0x19b   : > { %v1093_v63 = vadd.f32 %v1092_v61, %v2252_v37  ;;  %v1022_v1 = vadd.f32 %v1021_v62, %v2252_v37  ;;  %v1094_v3 = vpop.f32.mrb[61].mxu1  ;;  %v1023_v20 = vpop.f32.mrb[62].mxu0  ;;  %1302 = vst [vmem:[%s2481_s24 + $0x140] sm:$0xff] (%p1827_p6), %v1301_v35  ;;  %1304 = vst [vmem:[%s2481_s24 + $0x148] sm:$0xff] (%p1827_p6), %v1303_v36  ;;  %v1341_v56 = vld [vmem:[%s2200_s8 + $0x160] sm:$0xff] (%p1827_p6)  ;;  %v1343_v57 = vld [vmem:[%s2200_s8 + $0x168] sm:$0xff] (%p1827_p6) }
 0x19c   : > { %1209 = vst [vmem:[%s2200_s8 + $0x360] sm:$0xff] %v1020_v60  ;;  %v1095_v4 = vadd.f32 %v1094_v3, %v2252_v37  ;;  %v1024_v5 = vadd.f32 %v1023_v20, %v2255_v39  ;;  %v1096_v6 = vpop.f32.mrb[62].mxu1  ;;  %v1025_v7 = vpop.f32.mrb[63].mxu0  ;;  %v1253_v37 = vld [vmem:[%s2200_s8] sm:$0xff] (%p1827_p6)  ;;  %1306 = vst [vmem:[%s2481_s24 + $0x150] sm:$0xff] (%p1827_p6), %v1305_v38  ;;  %v1345_v58 = vld [vmem:[%s2200_s8 + $0x170] sm:$0xff] (%p1827_p6) }
 0x19d   : > { %1211 = vst [vmem:[%s2200_s8 + $0x370] sm:$0xff] %v1093_v63  ;;  %1210 = vst [vmem:[%s2200_s8 + $0x368] sm:$0xff] %v1022_v1  ;;  %v1097_v8 = vadd.f32 %v1096_v6, %v2255_v39  ;;  %v1026_v9 = vadd.f32 %v1025_v7, %v2255_v39  ;;  %v1098_v10 = vpop.f32.mrb[63].mxu1  ;;  %v1347_v59 = vld [vmem:[%s2200_s8 + $0x178] sm:$0xff] (%p1827_p6)  ;;  %v1349_v18 = vld [vmem:[%s2200_s8 + $0x180] sm:$0xff] (%p1827_p6) }
 0x19e   : > { %1212 = vst [vmem:[%s2200_s8 + $0x378] sm:$0xff] %v1095_v4  ;;  %1225 = vst [vmem:[%s2200_s8 + $0x3e0] sm:$0xff] %v1024_v5  ;;  %v1099_v11 = vadd.f32 %v1098_v10, %v2255_v39  ;;  %v1255_v39 = vld [vmem:[%s2200_s8 + $0x8] sm:$0xff] (%p1827_p6)  ;;  %v1353_v61 = vld [vmem:[%s2200_s8 + $0x190] sm:$0xff] (%p1827_p6) }
 0x19f   : > { %1227 = vst [vmem:[%s2200_s8 + $0x3f0] sm:$0xff] %v1097_v8  ;;  %1226 = vst [vmem:[%s2200_s8 + $0x3e8] sm:$0xff] %v1026_v9  ;;  %v1351_v60 = vld [vmem:[%s2200_s8 + $0x188] sm:$0xff] (%p1827_p6)  ;;  %v1355_v62 = vld [vmem:[%s2200_s8 + $0x198] sm:$0xff] (%p1827_p6) }
 0x1a0   : > { %1228 = vst [vmem:[%s2200_s8 + $0x3f8] sm:$0xff] %v1099_v11  ;;  %1254 = vst [vmem:[%s2481_s24] sm:$0xff] (%p1827_p6), %v1253_v37  ;;  %v1357_v63 = vld [vmem:[%s2200_s8 + $0x1a0] sm:$0xff] (%p1827_p6)  ;;  %v1359_v1 = vld [vmem:[%s2200_s8 + $0x1a8] sm:$0xff] (%p1827_p6) }
 0x1a1   : > { %1256 = vst [vmem:[%s2481_s24 + $0x8] sm:$0xff] %v1255_v39  ;;  %1308 = vst [vmem:[%s2481_s24 + $0x158] sm:$0xff] %v1307_v40  ;;  %v1361_v3 = vld [vmem:[%s2200_s8 + $0x1b0] sm:$0xff]  ;;  %v1363_v20 = vld [vmem:[%s2200_s8 + $0x1b8] sm:$0xff] }
 0x1a2   : > { %1310 = vst [vmem:[%s2481_s24 + $0x160] sm:$0xff] %v1309_v41  ;;  %1312 = vst [vmem:[%s2481_s24 + $0x168] sm:$0xff] %v1311_v42  ;;  %v1365_v4 = vld [vmem:[%s2200_s8 + $0x1c0] sm:$0xff]  ;;  %v1367_v5 = vld [vmem:[%s2200_s8 + $0x1c8] sm:$0xff] }
 0x1a3   : > { %1314 = vst [vmem:[%s2481_s24 + $0x170] sm:$0xff] %v1313_v43  ;;  %1316 = vst [vmem:[%s2481_s24 + $0x178] sm:$0xff] %v1315_v44  ;;  %v1369_v6 = vld [vmem:[%s2200_s8 + $0x1d0] sm:$0xff]  ;;  %v1371_v7 = vld [vmem:[%s2200_s8 + $0x1d8] sm:$0xff] }
 0x1a4   : > { %1318 = vst [vmem:[%s2481_s24 + $0x200] sm:$0xff] %v1317_v47  ;;  %1320 = vst [vmem:[%s2481_s24 + $0x208] sm:$0xff] %v1319_v45  ;;  %v1373_v8 = vld [vmem:[%s2200_s8 + $0x1e0] sm:$0xff]  ;;  %v1375_v9 = vld [vmem:[%s2200_s8 + $0x1e8] sm:$0xff] }
 0x1a5   : > { %1322 = vst [vmem:[%s2481_s24 + $0x210] sm:$0xff] %v1321_v46  ;;  %1324 = vst [vmem:[%s2481_s24 + $0x218] sm:$0xff] %v1323_v48  ;;  %v1377_v10 = vld [vmem:[%s2200_s8 + $0x1f0] sm:$0xff]  ;;  %v1379_v11 = vld [vmem:[%s2200_s8 + $0x1f8] sm:$0xff] }
 0x1a6   : > { %1326 = vst [vmem:[%s2481_s24 + $0x220] sm:$0xff] %v1325_v50  ;;  %1328 = vst [vmem:[%s2481_s24 + $0x228] sm:$0xff] %v1327_v51  ;;  %v1381_v37 = vld [vmem:[%s2200_s8 + $0x200] sm:$0xff]  ;;  %v1383_v39 = vld [vmem:[%s2200_s8 + $0x208] sm:$0xff] }
 0x1a7   : > { %1330 = vst [vmem:[%s2481_s24 + $0x230] sm:$0xff] %v1329_v52  ;;  %1332 = vst [vmem:[%s2481_s24 + $0x238] sm:$0xff] %v1331_v2  ;;  %v1395_v17 = vld [vmem:[%s2200_s8 + $0x238] sm:$0xff]  ;;  %v1397_v19 = vld [vmem:[%s2200_s8 + $0x240] sm:$0xff] }
 0x1a8   : > { %1334 = vst [vmem:[%s2481_s24 + $0x240] sm:$0xff] %v1333_v0  ;;  %1336 = vst [vmem:[%s2481_s24 + $0x248] sm:$0xff] %v1335_v53  ;;  %v1399_v21 = vld [vmem:[%s2200_s8 + $0x248] sm:$0xff]  ;;  %v1401_v22 = vld [vmem:[%s2200_s8 + $0x250] sm:$0xff] }
 0x1a9   : > { %1338 = vst [vmem:[%s2481_s24 + $0x250] sm:$0xff] %v1337_v54  ;;  %1340 = vst [vmem:[%s2481_s24 + $0x258] sm:$0xff] %v1339_v55  ;;  %v1403_v23 = vld [vmem:[%s2200_s8 + $0x258] sm:$0xff]  ;;  %v1405_v25 = vld [vmem:[%s2200_s8 + $0x260] sm:$0xff] }
 0x1aa   : > { %1342 = vst [vmem:[%s2481_s24 + $0x260] sm:$0xff] %v1341_v56  ;;  %1344 = vst [vmem:[%s2481_s24 + $0x268] sm:$0xff] %v1343_v57  ;;  %v1407_v26 = vld [vmem:[%s2200_s8 + $0x268] sm:$0xff]  ;;  %v1409_v27 = vld [vmem:[%s2200_s8 + $0x270] sm:$0xff] }
 0x1ab   : > { %1346 = vst [vmem:[%s2481_s24 + $0x270] sm:$0xff] %v1345_v58  ;;  %1348 = vst [vmem:[%s2481_s24 + $0x278] sm:$0xff] %v1347_v59  ;;  %v1411_v28 = vld [vmem:[%s2200_s8 + $0x278] sm:$0xff]  ;;  %v1413_v24 = vld [vmem:[%s2200_s8 + $0x280] sm:$0xff] }
 0x1ac   : > { %1350 = vst [vmem:[%s2481_s24 + $0x300] sm:$0xff] %v1349_v18  ;;  %1352 = vst [vmem:[%s2481_s24 + $0x308] sm:$0xff] %v1351_v60  ;;  %v1415_v29 = vld [vmem:[%s2200_s8 + $0x288] sm:$0xff]  ;;  %v1417_v30 = vld [vmem:[%s2200_s8 + $0x290] sm:$0xff] }
 0x1ad   : > { %1354 = vst [vmem:[%s2481_s24 + $0x310] sm:$0xff] %v1353_v61  ;;  %1356 = vst [vmem:[%s2481_s24 + $0x318] sm:$0xff] %v1355_v62  ;;  %v1419_v31 = vld [vmem:[%s2200_s8 + $0x298] sm:$0xff]  ;;  %v1421_v32 = vld [vmem:[%s2200_s8 + $0x2a0] sm:$0xff] }
 0x1ae   : > { %1358 = vst [vmem:[%s2481_s24 + $0x320] sm:$0xff] %v1357_v63  ;;  %1360 = vst [vmem:[%s2481_s24 + $0x328] sm:$0xff] %v1359_v1  ;;  %v1423_v33 = vld [vmem:[%s2200_s8 + $0x2a8] sm:$0xff]  ;;  %v1425_v34 = vld [vmem:[%s2200_s8 + $0x2b0] sm:$0xff] }
 0x1af   : > { %1362 = vst [vmem:[%s2481_s24 + $0x330] sm:$0xff] %v1361_v3  ;;  %1364 = vst [vmem:[%s2481_s24 + $0x338] sm:$0xff] %v1363_v20  ;;  %v1427_v49 = vld [vmem:[%s2200_s8 + $0x2b8] sm:$0xff]  ;;  %v1429_v35 = vld [vmem:[%s2200_s8 + $0x2c0] sm:$0xff] }
 0x1b0   : > { %1366 = vst [vmem:[%s2481_s24 + $0x340] sm:$0xff] %v1365_v4  ;;  %1368 = vst [vmem:[%s2481_s24 + $0x348] sm:$0xff] %v1367_v5  ;;  %v1431_v36 = vld [vmem:[%s2200_s8 + $0x2c8] sm:$0xff]  ;;  %v1433_v38 = vld [vmem:[%s2200_s8 + $0x2d0] sm:$0xff] }
 0x1b1   : > { %1370 = vst [vmem:[%s2481_s24 + $0x350] sm:$0xff] %v1369_v6  ;;  %1372 = vst [vmem:[%s2481_s24 + $0x358] sm:$0xff] %v1371_v7  ;;  %v1435_v40 = vld [vmem:[%s2200_s8 + $0x2d8] sm:$0xff]  ;;  %v1437_v41 = vld [vmem:[%s2200_s8 + $0x2e0] sm:$0xff] }
 0x1b2   : > { %1374 = vst [vmem:[%s2481_s24 + $0x360] sm:$0xff] %v1373_v8  ;;  %1376 = vst [vmem:[%s2481_s24 + $0x368] sm:$0xff] %v1375_v9  ;;  %v1439_v42 = vld [vmem:[%s2200_s8 + $0x2e8] sm:$0xff]  ;;  %v1441_v43 = vld [vmem:[%s2200_s8 + $0x2f0] sm:$0xff] }
 0x1b3   : > { %1378 = vst [vmem:[%s2481_s24 + $0x370] sm:$0xff] %v1377_v10  ;;  %1380 = vst [vmem:[%s2481_s24 + $0x378] sm:$0xff] %v1379_v11  ;;  %v1443_v44 = vld [vmem:[%s2200_s8 + $0x2f8] sm:$0xff]  ;;  %v1445_v47 = vld [vmem:[%s2200_s8 + $0x300] sm:$0xff] }
 0x1b4   : > { %1382 = vst [vmem:[%s2481_s24 + $0x400] sm:$0xff] %v1381_v37  ;;  %1384 = vst [vmem:[%s2481_s24 + $0x408] sm:$0xff] %v1383_v39  ;;  %v1447_v45 = vld [vmem:[%s2200_s8 + $0x308] sm:$0xff]  ;;  %v1449_v46 = vld [vmem:[%s2200_s8 + $0x310] sm:$0xff] }
 0x1b5   : > { %1386 = vst [vmem:[%s2481_s24 + $0x410] sm:$0xff] %v1385_v12  ;;  %1388 = vst [vmem:[%s2481_s24 + $0x418] sm:$0xff] %v1387_v13  ;;  %v1451_v48 = vld [vmem:[%s2200_s8 + $0x318] sm:$0xff]  ;;  %v1453_v50 = vld [vmem:[%s2200_s8 + $0x320] sm:$0xff] }
 0x1b6   : > { %1390 = vst [vmem:[%s2481_s24 + $0x420] sm:$0xff] %v1389_v14  ;;  %1392 = vst [vmem:[%s2481_s24 + $0x428] sm:$0xff] %v1391_v15  ;;  %v1455_v51 = vld [vmem:[%s2200_s8 + $0x328] sm:$0xff]  ;;  %v1457_v52 = vld [vmem:[%s2200_s8 + $0x330] sm:$0xff] }
 0x1b7   : > { %1394 = vst [vmem:[%s2481_s24 + $0x430] sm:$0xff] %v1393_v16  ;;  %1396 = vst [vmem:[%s2481_s24 + $0x438] sm:$0xff] %v1395_v17  ;;  %v1459_v2 = vld [vmem:[%s2200_s8 + $0x338] sm:$0xff]  ;;  %v1461_v0 = vld [vmem:[%s2200_s8 + $0x340] sm:$0xff] }
 0x1b8   : > { %1398 = vst [vmem:[%s2481_s24 + $0x440] sm:$0xff] %v1397_v19  ;;  %1400 = vst [vmem:[%s2481_s24 + $0x448] sm:$0xff] %v1399_v21  ;;  %v1463_v53 = vld [vmem:[%s2200_s8 + $0x348] sm:$0xff]  ;;  %v1465_v54 = vld [vmem:[%s2200_s8 + $0x350] sm:$0xff] }
 0x1b9   : > { %1402 = vst [vmem:[%s2481_s24 + $0x450] sm:$0xff] %v1401_v22  ;;  %1404 = vst [vmem:[%s2481_s24 + $0x458] sm:$0xff] %v1403_v23  ;;  %v1467_v55 = vld [vmem:[%s2200_s8 + $0x358] sm:$0xff]  ;;  %v1469_v56 = vld [vmem:[%s2200_s8 + $0x360] sm:$0xff] }
 0x1ba   : > { %1406 = vst [vmem:[%s2481_s24 + $0x460] sm:$0xff] %v1405_v25  ;;  %1408 = vst [vmem:[%s2481_s24 + $0x468] sm:$0xff] %v1407_v26  ;;  %v1471_v57 = vld [vmem:[%s2200_s8 + $0x368] sm:$0xff]  ;;  %v1473_v58 = vld [vmem:[%s2200_s8 + $0x370] sm:$0xff] }
 0x1bb   : > { %1410 = vst [vmem:[%s2481_s24 + $0x470] sm:$0xff] %v1409_v27  ;;  %1412 = vst [vmem:[%s2481_s24 + $0x478] sm:$0xff] %v1411_v28  ;;  %v1475_v59 = vld [vmem:[%s2200_s8 + $0x378] sm:$0xff]  ;;  %v1477_v18 = vld [vmem:[%s2200_s8 + $0x380] sm:$0xff] }
 0x1bc   : > { %1414 = vst [vmem:[%s2481_s24 + $0x500] sm:$0xff] %v1413_v24  ;;  %1416 = vst [vmem:[%s2481_s24 + $0x508] sm:$0xff] %v1415_v29  ;;  %v1479_v60 = vld [vmem:[%s2200_s8 + $0x388] sm:$0xff]  ;;  %v1481_v61 = vld [vmem:[%s2200_s8 + $0x390] sm:$0xff] }
 0x1bd   : > { %1418 = vst [vmem:[%s2481_s24 + $0x510] sm:$0xff] %v1417_v30  ;;  %1420 = vst [vmem:[%s2481_s24 + $0x518] sm:$0xff] %v1419_v31  ;;  %v1483_v62 = vld [vmem:[%s2200_s8 + $0x398] sm:$0xff]  ;;  %v1485_v63 = vld [vmem:[%s2200_s8 + $0x3a0] sm:$0xff] }
 0x1be   : > { %1422 = vst [vmem:[%s2481_s24 + $0x520] sm:$0xff] %v1421_v32  ;;  %1424 = vst [vmem:[%s2481_s24 + $0x528] sm:$0xff] %v1423_v33  ;;  %v1487_v1 = vld [vmem:[%s2200_s8 + $0x3a8] sm:$0xff]  ;;  %v1489_v3 = vld [vmem:[%s2200_s8 + $0x3b0] sm:$0xff] }
 0x1bf   : > { %1426 = vst [vmem:[%s2481_s24 + $0x530] sm:$0xff] %v1425_v34  ;;  %1428 = vst [vmem:[%s2481_s24 + $0x538] sm:$0xff] %v1427_v49  ;;  %v1491_v20 = vld [vmem:[%s2200_s8 + $0x3b8] sm:$0xff]  ;;  %v1493_v4 = vld [vmem:[%s2200_s8 + $0x3c0] sm:$0xff] }
 0x1c0   : > { %1430 = vst [vmem:[%s2481_s24 + $0x540] sm:$0xff] %v1429_v35  ;;  %1432 = vst [vmem:[%s2481_s24 + $0x548] sm:$0xff] %v1431_v36  ;;  %v1495_v5 = vld [vmem:[%s2200_s8 + $0x3c8] sm:$0xff]  ;;  %v1497_v6 = vld [vmem:[%s2200_s8 + $0x3d0] sm:$0xff] }
 0x1c1   : > { %1434 = vst [vmem:[%s2481_s24 + $0x550] sm:$0xff] %v1433_v38  ;;  %1436 = vst [vmem:[%s2481_s24 + $0x558] sm:$0xff] %v1435_v40  ;;  %v1499_v7 = vld [vmem:[%s2200_s8 + $0x3d8] sm:$0xff]  ;;  %v1501_v8 = vld [vmem:[%s2200_s8 + $0x3e0] sm:$0xff] }
 0x1c2   : > { %1438 = vst [vmem:[%s2481_s24 + $0x560] sm:$0xff] %v1437_v41  ;;  %1440 = vst [vmem:[%s2481_s24 + $0x568] sm:$0xff] %v1439_v42  ;;  %v1503_v9 = vld [vmem:[%s2200_s8 + $0x3e8] sm:$0xff]  ;;  %v1505_v10 = vld [vmem:[%s2200_s8 + $0x3f0] sm:$0xff] }
 0x1c3   : > { %1442 = vst [vmem:[%s2481_s24 + $0x570] sm:$0xff] %v1441_v43  ;;  %1444 = vst [vmem:[%s2481_s24 + $0x578] sm:$0xff] %v1443_v44  ;;  %v1507_v11 = vld [vmem:[%s2200_s8 + $0x3f8] sm:$0xff] }
 0x1c4   : > { %1446 = vst [vmem:[%s2481_s24 + $0x600] sm:$0xff] %v1445_v47  ;;  %1448 = vst [vmem:[%s2481_s24 + $0x608] sm:$0xff] %v1447_v45 }
 0x1c5   : > { %1450 = vst [vmem:[%s2481_s24 + $0x610] sm:$0xff] %v1449_v46  ;;  %1452 = vst [vmem:[%s2481_s24 + $0x618] sm:$0xff] %v1451_v48 }
 0x1c6   : > { %1454 = vst [vmem:[%s2481_s24 + $0x620] sm:$0xff] %v1453_v50  ;;  %1456 = vst [vmem:[%s2481_s24 + $0x628] sm:$0xff] %v1455_v51 }
 0x1c7   : > { %1458 = vst [vmem:[%s2481_s24 + $0x630] sm:$0xff] %v1457_v52  ;;  %1460 = vst [vmem:[%s2481_s24 + $0x638] sm:$0xff] %v1459_v2 }
 0x1c8   : > { %1462 = vst [vmem:[%s2481_s24 + $0x640] sm:$0xff] %v1461_v0  ;;  %1464 = vst [vmem:[%s2481_s24 + $0x648] sm:$0xff] %v1463_v53 }
 0x1c9   : > { %1466 = vst [vmem:[%s2481_s24 + $0x650] sm:$0xff] %v1465_v54  ;;  %1468 = vst [vmem:[%s2481_s24 + $0x658] sm:$0xff] %v1467_v55 }
 0x1ca   : > { %1470 = vst [vmem:[%s2481_s24 + $0x660] sm:$0xff] %v1469_v56  ;;  %1472 = vst [vmem:[%s2481_s24 + $0x668] sm:$0xff] %v1471_v57 }
 0x1cb   : > { %1474 = vst [vmem:[%s2481_s24 + $0x670] sm:$0xff] %v1473_v58  ;;  %1476 = vst [vmem:[%s2481_s24 + $0x678] sm:$0xff] %v1475_v59 }
 0x1cc   : > { %1478 = vst [vmem:[%s2481_s24 + $0x700] sm:$0xff] %v1477_v18  ;;  %1480 = vst [vmem:[%s2481_s24 + $0x708] sm:$0xff] %v1479_v60 }
 0x1cd   : > { %1482 = vst [vmem:[%s2481_s24 + $0x710] sm:$0xff] %v1481_v61  ;;  %1484 = vst [vmem:[%s2481_s24 + $0x718] sm:$0xff] %v1483_v62 }
 0x1ce   : > { %1486 = vst [vmem:[%s2481_s24 + $0x720] sm:$0xff] %v1485_v63  ;;  %1488 = vst [vmem:[%s2481_s24 + $0x728] sm:$0xff] %v1487_v1 }
 0x1cf   : > { %1490 = vst [vmem:[%s2481_s24 + $0x730] sm:$0xff] %v1489_v3  ;;  %1492 = vst [vmem:[%s2481_s24 + $0x738] sm:$0xff] %v1491_v20 }
 0x1d0   : > { %1494 = vst [vmem:[%s2481_s24 + $0x740] sm:$0xff] %v1493_v4  ;;  %1496 = vst [vmem:[%s2481_s24 + $0x748] sm:$0xff] %v1495_v5 }
 0x1d1   : > { %1498 = vst [vmem:[%s2481_s24 + $0x750] sm:$0xff] %v1497_v6  ;;  %1500 = vst [vmem:[%s2481_s24 + $0x758] sm:$0xff] %v1499_v7 }
 0x1d2   : > { %1502 = vst [vmem:[%s2481_s24 + $0x760] sm:$0xff] %v1501_v8  ;;  %1504 = vst [vmem:[%s2481_s24 + $0x768] sm:$0xff] %v1503_v9 }
 0x1d3   : > { %1506 = vst [vmem:[%s2481_s24 + $0x770] sm:$0xff] %v1505_v10  ;;  %1508 = vst [vmem:[%s2481_s24 + $0x778] sm:$0xff] %v1507_v11 }
 0x1d4 PF: > { %s13_s18 = sadd.s32 1, %s1756_s18   ;;  %s2756_s12 = smov %s1736_s13 }
 0x1d5   : > { %p10_p12 = scmp.ge.s32.totalorder %s13_s18, 6   ;;  %s2757_s13 = smov %s1835_s27 }
 0x1d6   : > { %s2758_s14 = smov %s1748_s16  ;;  %s2759_s15 = smov %s1752_s17 }
 0x1d7   : > { %s2760_s16 = smov %s2763_s19  ;;  %s2761_s17 = smov %s2767_s20 }
 0x1d8   :  { %12 = sbr.rel (!%p10_p12) target bundleno = 4 (0x4), region = 113 }

</bundles_post_ra>
